<compile_context>
chip_gen: v5e
topology: v5e:2x2
jax: 0.10.0
libtpu: 0.0.40
codegen_flags: <defaults>
</compile_context>

<pallas_src>
import functools

import jax
import jax.numpy as jnp
from jax.experimental import pallas as pl
from jax.experimental.pallas import tpu as pltpu

# ---------------------------------------------------------------- constants --
VOX = 8                         # voxel grid side -> V = 512
V = VOX ** 3
FEAT = 3                        # per-point image feature channels (RGB-like)
C_VOX = 3 + FEAT + 1            # voxel channels: mean xyz + mean feat + occupancy
SUM_ROWS = 8                    # C_VOX padded to a sublane-friendly 8 rows
HID = 32                        # q-net hidden width
PROP = 4                        # proprio dim
ROT_RES = 90.0                  # rotation_resolution
NUM_ROT = int(360 // ROT_RES)
ROT_GRIP = 3 * NUM_ROT + 2      # rot-x/y/z bins + 2 grip logits (= 14)

# weight-slab layout: one (40, 128) f32 slab instead of 7 tiny inputs
WS_ROWS = 40
WS_COLS = 128
COL_W1 = 0                      # rows 0:HID, cols 0:SUM_ROWS  -> w1^T (pad col zero)
COL_WP = 8                      # rows 0:HID, cols 8:8+PROP    -> wp^T
COL_B1 = 12                     # rows 0:HID, col 12           -> b1 column
COL_W3 = 16                     # rows 0:HID, cols 16:30       -> w3 (non-transposed)
ROW_W2 = HID                    # row 32, cols 0:HID           -> w2^T row
ROW_B2 = HID + 1                # row 33, col 0                -> b2
ROW_B3 = HID + 2                # row 34, cols 0:ROT_GRIP      -> b3 row

PAR_COLS = 16                   # per-batch SMEM scalars: [bmin(3), inv_res(3), pad2, proprio(4), pad4]


# ------------------------------------------------------------- fused kernel --
def _qfunc_kernel(par_ref, pcd_cm_ref, feat_cm_ref, ws_ref,
                  grid_ref, qtrans_ref, qrot_ref, sums_ref,
                  *, n_valid, n_padded):
    i = pl.program_id(0)           # batch
    ic = pl.program_id(1)          # point-chunk
    nc = pl.num_programs(1)

    @pl.when(ic == 0)
    def _init():
        sums_ref[...] = jnp.zeros_like(sums_ref)

    # per-batch scalars from SMEM (scalar prefetch)
    bx = par_ref[i, 0]
    by = par_ref[i, 1]
    bz = par_ref[i, 2]
    rx = par_ref[i, 3]
    ry = par_ref[i, 4]
    rz = par_ref[i, 5]

    # ---- lane-dense per-point voxel index (points on the 128-lane axis) ----
    p = pcd_cm_ref[0]                                           # (3, chunk) f32
    chunk = p.shape[1]
    ix = jnp.clip(jnp.floor((p[0:1, :] - bx) * rx), 0.0, VOX - 1.0)
    iy = jnp.clip(jnp.floor((p[1:2, :] - by) * ry), 0.0, VOX - 1.0)
    iz = jnp.clip(jnp.floor((p[2:3, :] - bz) * rz), 0.0, VOX - 1.0)
    flat_row = (ix * (VOX * VOX) + iy * VOX + iz).astype(jnp.int32)   # (1, chunk)

    # padding points (only when the wrapper padded the point axis) get an
    # out-of-range index so their one-hot row is all zeros.
    if n_valid != n_padded:
        lane = jax.lax.broadcasted_iota(jnp.int32, (1, chunk), 1)
        flat_row = jnp.where(lane + ic * chunk < n_valid, flat_row, V)

    # single small relayout: one int32 row (~8 KB) lanes -> sublanes
    flat_col = jnp.transpose(flat_row)                          # (chunk, 1)
    vox_iota = jax.lax.broadcasted_iota(jnp.int32, (chunk, V), 1)
    onehot = (vox_iota == flat_col).astype(jnp.bfloat16)        # (chunk, V) bf16

    # ---- values to scatter (channel-major, bf16 into the MXU, f32 accum) ----
    f = feat_cm_ref[0]                                          # (FEAT, chunk)
    vals = jnp.concatenate(
        [p.astype(jnp.bfloat16),
         f.astype(jnp.bfloat16),
         jnp.ones((1, chunk), jnp.bfloat16),                    # count row
         jnp.zeros((SUM_ROWS - C_VOX, chunk), jnp.bfloat16)],   # pad row
        axis=0)                                                 # (8, chunk)

    sums_ref[...] += jnp.dot(vals, onehot,
                             preferred_element_type=jnp.float32)  # (8, V) f32

    # ---- last point-chunk: finish the voxel grid + run the fused q-net. ----
    @pl.when(ic == nc - 1)
    def _finish():
        sums = sums_ref[...]
        count = sums[C_VOX - 1:C_VOX, :]                        # (1, V)
        inv_cnt = 1.0 / jnp.maximum(count, 1.0)
        mean_part = sums[0:C_VOX - 1, :] * inv_cnt              # (6, V)
        occ = (count > 0.0).astype(jnp.float32)                 # (1, V)
        zrow = jnp.zeros((SUM_ROWS - C_VOX, V), jnp.float32)
        vox8 = jnp.concatenate([mean_part, occ, zrow], axis=0)  # (8, V)
        grid_ref[0] = vox8[0:C_VOX, :]

        # layer 1: per-voxel 1x1x1 conv (channel matmul) + proprio + bias, ReLU
        w1t = ws_ref[0:HID, COL_W1:COL_W1 + SUM_ROWS]           # (HID, 8)
        h = jnp.dot(w1t, vox8, preferred_element_type=jnp.float32)  # (HID, V)
        bias = ws_ref[0:HID, COL_B1:COL_B1 + 1]                 # (HID, 1)
        wpt = ws_ref[0:HID, COL_WP:COL_WP + PROP]               # (HID, PROP)
        for k in range(PROP):
            bias = bias + wpt[:, k:k + 1] * par_ref[i, 8 + k]
        h = jnp.maximum(h + bias, 0.0)

        # translation head: one logit per voxel, lane-dense (1, V)
        w2t = ws_ref[ROW_W2:ROW_W2 + 1, 0:HID]                  # (1, HID)
        b2 = ws_ref[ROW_B2:ROW_B2 + 1, 0:1]                     # (1, 1)
        qtrans_ref[0] = jnp.dot(w2t, h,
                                preferred_element_type=jnp.float32) + b2

        # rotation / grip head: global mean pool -> lane-oriented row output
        pooled = jnp.mean(h, axis=1, keepdims=True)             # (HID, 1)
        pooled_row = jnp.transpose(pooled)                      # (1, HID)
        w3 = ws_ref[0:HID, COL_W3:COL_W3 + ROT_GRIP]            # (HID, ROT_GRIP)
        b3 = ws_ref[ROW_B3:ROW_B3 + 1, 0:ROT_GRIP]              # (1, ROT_GRIP)
        qrot_ref[0] = jnp.dot(pooled_row, w3,
                              preferred_element_type=jnp.float32) + b3


# -------------------------------------------------------------- weight slab --
def _pack_weights(weights):
    w1, wp, b1, w2, b2, w3, b3 = weights
    slab = jnp.zeros((WS_ROWS, WS_COLS), jnp.float32)
    slab = slab.at[0:HID, COL_W1:COL_W1 + C_VOX].set(w1.T)          # (HID, C_VOX)
    slab = slab.at[0:HID, COL_WP:COL_WP + PROP].set(wp.T)           # (HID, PROP)
    slab = slab.at[0:HID, COL_B1:COL_B1 + 1].set(b1.T)              # (HID, 1)
    slab = slab.at[0:HID, COL_W3:COL_W3 + ROT_GRIP].set(w3)         # (HID, ROT_GRIP)
    slab = slab.at[ROW_W2:ROW_W2 + 1, 0:HID].set(w2.T)              # (1, HID)
    slab = slab.at[ROW_B2:ROW_B2 + 1, 0:1].set(b2)                  # (1, 1)
    slab = slab.at[ROW_B3:ROW_B3 + 1, 0:ROT_GRIP].set(b3)           # (1, ROT_GRIP)
    return slab


# -------------------------------------------------- per-generation tile pick --
def _pick_chunk_and_vmem():
    """Chunk size / vmem limit per chip generation (128 MiB vs 64 MiB VMEM)."""
    try:
        vmem_cap = int(pltpu.get_tpu_info().vmem_capacity_bytes)
    except Exception:
        vmem_cap = 64 * 1024 * 1024          # conservative fallback
    if vmem_cap >= 100 * 1024 * 1024:        # v5e / v6e: 128 MiB VMEM
        return 4096, 96 * 1024 * 1024
    return 2048, 40 * 1024 * 1024            # v7x: 64 MiB VMEM


# ------------------------------------------------------- QFunction.forward --
def qfunction_forward(x, proprio, pcd, bounds, weights):
    """Mirrors QFunction.forward: returns (q_trans, rot_and_grip_q, voxel_grid)."""
    b = x[0][0].shape[0]

    # channel-major flattening: NCHW -> (b, C, N) is a pure reshape (no transpose)
    pcd_cm = jnp.concatenate([p.reshape(b, 3, -1) for p in pcd], axis=-1)
    image_features = [xx[0] for xx in x]
    feat_size = image_features[0].shape[1]
    assert feat_size == FEAT
    feat_cm = jnp.concatenate(
        [p.reshape(b, feat_size, -1) for p in image_features], axis=-1)
    n = pcd_cm.shape[-1]

    max_chunk, vmem_limit = _pick_chunk_and_vmem()
    chunk = min(max_chunk, ((n + 127) // 128) * 128)
    n_pad = ((n + chunk - 1) // chunk) * chunk
    if n_pad != n:
        pcd_cm = jnp.pad(pcd_cm, ((0, 0), (0, 0), (0, n_pad - n)))
        feat_cm = jnp.pad(feat_cm, ((0, 0), (0, 0), (0, n_pad - n)))
    nc = n_pad // chunk

    # per-batch scalars (SMEM via scalar prefetch):
    # [bmin(3), inv_res(3), pad(2), proprio(PROP), pad]
    bmin = bounds[:, 0:3]
    bmax = bounds[:, 3:6]
    inv_res = VOX / (bmax - bmin)
    params = jnp.concatenate(
        [bmin, inv_res, jnp.zeros((b, 2), jnp.float32),
         proprio.astype(jnp.float32),
         jnp.zeros((b, PAR_COLS - 8 - PROP), jnp.float32)],
        axis=-1)                                                 # (b, PAR_COLS)

    wslab = _pack_weights(weights)

    kernel = functools.partial(_qfunc_kernel, n_valid=n, n_padded=n_pad)

    flops = int(b * (2 * n_pad * SUM_ROWS * V + 2 * SUM_ROWS * HID * V
                     + 2 * HID * V + 2 * HID * ROT_GRIP))
    bytes_accessed = int((pcd_cm.size + feat_cm.size + params.size + wslab.size
                          + b * (C_VOX * V + V + ROT_GRIP)) * 4)

    grid_flat, qtrans_flat, qrot_row = pl.pallas_call(
        kernel,
        out_shape=(
            jax.ShapeDtypeStruct((b, C_VOX, V), jnp.float32),
            jax.ShapeDtypeStruct((b, 1, V), jnp.float32),
            jax.ShapeDtypeStruct((b, 1, ROT_GRIP), jnp.float32),
        ),
        grid_spec=pltpu.PrefetchScalarGridSpec(
            num_scalar_prefetch=1,
            grid=(b, nc),
            in_specs=[
                pl.BlockSpec((1, 3, chunk), lambda i, c, par: (i, 0, c)),
                pl.BlockSpec((1, FEAT, chunk), lambda i, c, par: (i, 0, c)),
                pl.BlockSpec((WS_ROWS, WS_COLS), lambda i, c, par: (0, 0)),
            ],
            out_specs=[
                pl.BlockSpec((1, C_VOX, V), lambda i, c, par: (i, 0, 0)),
                pl.BlockSpec((1, 1, V), lambda i, c, par: (i, 0, 0)),
                pl.BlockSpec((1, 1, ROT_GRIP), lambda i, c, par: (i, 0, 0)),
            ],
            scratch_shapes=[pltpu.VMEM((SUM_ROWS, V), jnp.float32)],
        ),
        compiler_params=pltpu.CompilerParams(
            dimension_semantics=("parallel", "arbitrary"),
            vmem_limit_bytes=vmem_limit),
        cost_estimate=pl.CostEstimate(
            flops=flops, transcendentals=0, bytes_accessed=bytes_accessed),
    )(params, pcd_cm, feat_cm, wslab)

    # back to PyTorch layouts via pure reshapes (no transposes needed)
    q_trans = qtrans_flat.reshape(b, 1, VOX, VOX, VOX)
    rot_and_grip_q = qrot_row.reshape(b, ROT_GRIP)
    voxel_grid = grid_flat.reshape(b, C_VOX, VOX, VOX, VOX)
    return q_trans, rot_and_grip_q, voxel_grid


# --------------------------------------------------------------------- main --
def _init_weights(key):
    ks = jax.random.split(key, 7)
    w1 = 0.1 * jax.random.normal(ks[0], (C_VOX, HID), jnp.float32)
    wp = 0.1 * jax.random.normal(ks[1], (PROP, HID), jnp.float32)
    b1 = 0.1 * jax.random.normal(ks[2], (1, HID), jnp.float32)
    w2 = 0.1 * jax.random.normal(ks[3], (HID, 1), jnp.float32)
    b2 = 0.1 * jax.random.normal(ks[4], (1, 1), jnp.float32)
    w3 = 0.1 * jax.random.normal(ks[5], (HID, ROT_GRIP), jnp.float32)
    b3 = 0.1 * jax.random.normal(ks[6], (1, ROT_GRIP), jnp.float32)
    return (w1, wp, b1, w2, b2, w3, b3)


if __name__ == "__main__":
    key = jax.random.PRNGKey(0)
    k_feat, k_pcd, k_prop, k_w = jax.random.split(key, 4)

    B, H, W = 2, 16, 16

    # one camera: image features (b, FEAT, H, W), point cloud (b, 3, H, W)
    img_feat = jax.random.normal(k_feat, (B, FEAT, H, W), jnp.float32)
    pcd_img = jax.random.uniform(k_pcd, (B, 3, H, W), jnp.float32)   # in [0,1)^3
    proprio = jax.random.normal(k_prop, (B, PROP), jnp.float32)
    bounds = jnp.tile(jnp.array([[0.0, 0.0, 0.0, 1.0, 1.0, 1.0]], jnp.float32),
                      (B, 1))

    x = [[img_feat]]          # list of per-camera [features, ...]
    pcd = [pcd_img]           # list of per-camera point clouds
    weights = _init_weights(k_w)

    q_trans, rot_and_grip_q, voxel_grid = qfunction_forward(
        x, proprio, pcd, bounds, weights)

    jax.block_until_ready((q_trans, rot_and_grip_q, voxel_grid))
    assert q_trans.shape == (B, 1, VOX, VOX, VOX)
    assert rot_and_grip_q.shape == (B, ROT_GRIP)
    assert voxel_grid.shape == (B, C_VOX, VOX, VOX, VOX)
    assert bool(jnp.all(jnp.isfinite(q_trans)))
    assert bool(jnp.all(jnp.isfinite(rot_and_grip_q)))
    print("KERNEL_OK")
</pallas_src>

<mosaic_0001>
module attributes {stable_mosaic.version = 11 : i64} {
  func.func @_qfunc_kernel(%arg0: i32, %arg1: i32, %arg2: memref<2x16xf32, #tpu.memory_space<smem>>, %arg3: memref<1x3x256xf32, #tpu.memory_space<vmem>>, %arg4: memref<1x3x256xf32, #tpu.memory_space<vmem>>, %arg5: memref<40x128xf32, #tpu.memory_space<vmem>>, %arg6: memref<1x7x512xf32, #tpu.memory_space<vmem>>, %arg7: memref<1x1x512xf32, #tpu.memory_space<vmem>>, %arg8: memref<1x1x14xf32, #tpu.memory_space<vmem>>, %arg9: memref<8x512xf32, #tpu.memory_space<vmem>>) attributes {dimension_semantics = [#tpu.dimension_semantics<parallel>, #tpu.dimension_semantics<arbitrary>], iteration_bounds = array<i64: 2, 1>, scalar_prefetch = 1 : i64, scratch_operands = 1 : i64, tpu.core_type = #tpu.core_type<tc>, window_params = [{transform_indices = @transform_0, window_bounds = array<i64: 1, 3, 256>}, {transform_indices = @transform_1, window_bounds = array<i64: 1, 3, 256>}, {pipeline_mode = #tpu.pipeline_mode<synchronous>, transform_indices = @transform_2, window_bounds = array<i64: 40, 128>}, {transform_indices = @transform_3, window_bounds = array<i64: 1, 7, 512>}, {transform_indices = @transform_4, window_bounds = array<i64: 1, 1, 512>}, {transform_indices = @transform_5, window_bounds = array<i64: 1, 1, 14>}]} {
    %c0_i32 = arith.constant 0 : i32
    %0 = arith.cmpi eq, %arg1, %c0_i32 : i32
    %1 = arith.extui %0 : i1 to i32
    %c0_i32_0 = arith.constant 0 : i32
    %2 = arith.cmpi ne, %1, %c0_i32_0 : i32
    scf.if %2 {
      %cst_23 = arith.constant 0.000000e+00 : f32
      %75 = vector.broadcast %cst_23 : f32 to vector<8x512xf32>
      %c0_24 = arith.constant 0 : index
      %c0_25 = arith.constant 0 : index
      %76 = vector.load %arg9[%c0_24, %c0_25] : memref<8x512xf32, #tpu.memory_space<vmem>>, vector<8x512xf32>
      tpu.vector_store %arg9[%c0_24, %c0_25], %75 {strides = array<i32>} : memref<8x512xf32, #tpu.memory_space<vmem>>, vector<8x512xf32>,
    } else {
    }
    %3 = arith.index_cast %arg0 : i32 to index
    %c0 = arith.constant 0 : index
    %4 = memref.load %arg2[%3, %c0] : memref<2x16xf32, #tpu.memory_space<smem>>
    %5 = arith.index_cast %arg0 : i32 to index
    %c1 = arith.constant 1 : index
    %6 = memref.load %arg2[%5, %c1] : memref<2x16xf32, #tpu.memory_space<smem>>
    %7 = arith.index_cast %arg0 : i32 to index
    %c2 = arith.constant 2 : index
    %8 = memref.load %arg2[%7, %c2] : memref<2x16xf32, #tpu.memory_space<smem>>
    %9 = arith.index_cast %arg0 : i32 to index
    %c3 = arith.constant 3 : index
    %10 = memref.load %arg2[%9, %c3] : memref<2x16xf32, #tpu.memory_space<smem>>
    %11 = arith.index_cast %arg0 : i32 to index
    %c4 = arith.constant 4 : index
    %12 = memref.load %arg2[%11, %c4] : memref<2x16xf32, #tpu.memory_space<smem>>
    %13 = arith.index_cast %arg0 : i32 to index
    %c5 = arith.constant 5 : index
    %14 = memref.load %arg2[%13, %c5] : memref<2x16xf32, #tpu.memory_space<smem>>
    %c0_1 = arith.constant 0 : index
    %c0_2 = arith.constant 0 : index
    %c0_3 = arith.constant 0 : index
    %15 = vector.load %arg3[%c0_1, %c0_2, %c0_3] : memref<1x3x256xf32, #tpu.memory_space<vmem>>, vector<1x3x256xf32>
    %16 = vector.shape_cast %15 : vector<1x3x256xf32> to vector<3x256xf32>
    %17 = vector.extract_strided_slice %16 {offsets = [0, 0], sizes = [1, 256], strides = [1, 1]} : vector<3x256xf32> to vector<1x256xf32>
    %18 = vector.broadcast %4 : f32 to vector<1x256xf32>
    %19 = arith.subf %17, %18 : vector<1x256xf32>
    %20 = vector.broadcast %10 : f32 to vector<1x256xf32>
    %21 = arith.mulf %19, %20 : vector<1x256xf32>
    %22 = math.floor %21 : vector<1x256xf32>
    %cst = arith.constant 0.000000e+00 : f32
    %cst_4 = arith.constant 7.000000e+00 : f32
    %23 = vector.broadcast %cst : f32 to vector<1x256xf32>
    %24 = arith.maximumf %23, %22 : vector<1x256xf32>
    %25 = vector.broadcast %cst_4 : f32 to vector<1x256xf32>
    %26 = arith.minimumf %25, %24 : vector<1x256xf32>
    %27 = vector.extract_strided_slice %16 {offsets = [1, 0], sizes = [1, 256], strides = [1, 1]} : vector<3x256xf32> to vector<1x256xf32>
    %28 = vector.broadcast %6 : f32 to vector<1x256xf32>
    %29 = arith.subf %27, %28 : vector<1x256xf32>
    %30 = vector.broadcast %12 : f32 to vector<1x256xf32>
    %31 = arith.mulf %29, %30 : vector<1x256xf32>
    %32 = math.floor %31 : vector<1x256xf32>
    %cst_5 = arith.constant 0.000000e+00 : f32
    %cst_6 = arith.constant 7.000000e+00 : f32
    %33 = vector.broadcast %cst_5 : f32 to vector<1x256xf32>
    %34 = arith.maximumf %33, %32 : vector<1x256xf32>
    %35 = vector.broadcast %cst_6 : f32 to vector<1x256xf32>
    %36 = arith.minimumf %35, %34 : vector<1x256xf32>
    %37 = vector.extract_strided_slice %16 {offsets = [2, 0], sizes = [1, 256], strides = [1, 1]} : vector<3x256xf32> to vector<1x256xf32>
    %38 = vector.broadcast %8 : f32 to vector<1x256xf32>
    %39 = arith.subf %37, %38 : vector<1x256xf32>
    %40 = vector.broadcast %14 : f32 to vector<1x256xf32>
    %41 = arith.mulf %39, %40 : vector<1x256xf32>
    %42 = math.floor %41 : vector<1x256xf32>
    %cst_7 = arith.constant 0.000000e+00 : f32
    %cst_8 = arith.constant 7.000000e+00 : f32
    %43 = vector.broadcast %cst_7 : f32 to vector<1x256xf32>
    %44 = arith.maximumf %43, %42 : vector<1x256xf32>
    %45 = vector.broadcast %cst_8 : f32 to vector<1x256xf32>
    %46 = arith.minimumf %45, %44 : vector<1x256xf32>
    %cst_9 = arith.constant 6.400000e+01 : f32
    %47 = vector.broadcast %cst_9 : f32 to vector<1x256xf32>
    %48 = arith.mulf %26, %47 : vector<1x256xf32>
    %cst_10 = arith.constant 8.000000e+00 : f32
    %49 = vector.broadcast %cst_10 : f32 to vector<1x256xf32>
    %50 = arith.mulf %36, %49 : vector<1x256xf32>
    %51 = arith.addf %48, %50 : vector<1x256xf32>
    %52 = arith.addf %51, %46 : vector<1x256xf32>
    %53 = arith.fptosi %52 : vector<1x256xf32> to vector<1x256xi32>
    %54 = tpu.transpose %53, [1, 0] : vector<1x256xi32> -> vector<256x1xi32>
    %55 = tpu.iota {dimensions = array<i32: 1>} : vector<256x512xi32>
    %56 = vector.broadcast %54 : vector<256x1xi32> to vector<256x512xi32>
    %57 = arith.cmpi eq, %55, %56 : vector<256x512xi32>
    %58 = arith.extui %57 : vector<256x512xi1> to vector<256x512xi32>
    %59 = arith.sitofp %58 : vector<256x512xi32> to vector<256x512xf32>
    %60 = arith.truncf %59 : vector<256x512xf32> to vector<256x512xbf16>
    %c0_11 = arith.constant 0 : index
    %c0_12 = arith.constant 0 : index
    %c0_13 = arith.constant 0 : index
    %61 = vector.load %arg4[%c0_11, %c0_12, %c0_13] : memref<1x3x256xf32, #tpu.memory_space<vmem>>, vector<1x3x256xf32>
    %62 = vector.shape_cast %61 : vector<1x3x256xf32> to vector<3x256xf32>
    %63 = arith.truncf %16 : vector<3x256xf32> to vector<3x256xbf16>
    %64 = arith.truncf %62 : vector<3x256xf32> to vector<3x256xbf16>
    %cst_14 = arith.constant 1.000000e+00 : bf16
    %65 = vector.broadcast %cst_14 : bf16 to vector<1x256xbf16>
    %cst_15 = arith.constant 0.000000e+00 : bf16
    %66 = vector.broadcast %cst_15 : bf16 to vector<1x256xbf16>
    %67 = tpu.concatenate %63, %64, %65, %66 in 0 : vector<3x256xbf16>, vector<3x256xbf16>, vector<1x256xbf16>, vector<1x256xbf16> -> vector<8x256xbf16>
    %c0_16 = arith.constant 0 : index
    %c0_17 = arith.constant 0 : index
    %68 = vector.load %arg9[%c0_16, %c0_17] : memref<8x512xf32, #tpu.memory_space<vmem>>, vector<8x512xf32>
    %cst_18 = arith.constant dense<0.000000e+00> : vector<8x512xf32>
    %69 = tpu.matmul %67, %60, %cst_18 {dimension_numbers = #tpu.dot_dimension_numbers<[1], [0], [0], [1], [0, 0, 1, 1], [], []>} : vector<8x256xbf16>, vector<256x512xbf16>, vector<8x512xf32> -> vector<8x512xf32>
    %70 = arith.addf %68, %69 : vector<8x512xf32>
    %c0_19 = arith.constant 0 : index
    %c0_20 = arith.constant 0 : index
    %71 = vector.load %arg9[%c0_19, %c0_20] : memref<8x512xf32, #tpu.memory_space<vmem>>, vector<8x512xf32>
    tpu.vector_store %arg9[%c0_19, %c0_20], %70 {strides = array<i32>} : memref<8x512xf32, #tpu.memory_space<vmem>>, vector<8x512xf32>,
    %c0_i32_21 = arith.constant 0 : i32
    %72 = arith.cmpi eq, %arg1, %c0_i32_21 : i32
    %73 = arith.extui %72 : i1 to i32
    %c0_i32_22 = arith.constant 0 : i32
    %74 = arith.cmpi ne, %73, %c0_i32_22 : i32
    scf.if %74 {
      %c0_23 = arith.constant 0 : index
      %c0_24 = arith.constant 0 : index
      %75 = vector.load %arg9[%c0_23, %c0_24] : memref<8x512xf32, #tpu.memory_space<vmem>>, vector<8x512xf32>
      %76 = vector.extract_strided_slice %75 {offsets = [6, 0], sizes = [1, 512], strides = [1, 1]} : vector<8x512xf32> to vector<1x512xf32>
      %cst_25 = arith.constant 1.000000e+00 : f32
      %77 = vector.broadcast %cst_25 : f32 to vector<1x512xf32>
      %78 = arith.maximumf %76, %77 : vector<1x512xf32>
      %cst_26 = arith.constant 1.000000e+00 : f32
      %79 = vector.broadcast %cst_26 : f32 to vector<1x512xf32>
      %80 = arith.divf %79, %78 : vector<1x512xf32>
      %81 = vector.extract_strided_slice %75 {offsets = [0, 0], sizes = [6, 512], strides = [1, 1]} : vector<8x512xf32> to vector<6x512xf32>
      %82 = vector.broadcast %80 : vector<1x512xf32> to vector<6x512xf32>
      %83 = arith.mulf %81, %82 : vector<6x512xf32>
      %cst_27 = arith.constant 0.000000e+00 : f32
      %84 = vector.broadcast %cst_27 : f32 to vector<1x512xf32>
      %85 = arith.cmpf ogt, %76, %84 : vector<1x512xf32>
      %86 = arith.extui %85 : vector<1x512xi1> to vector<1x512xi32>
      %87 = arith.sitofp %86 : vector<1x512xi32> to vector<1x512xf32>
      %cst_28 = arith.constant 0.000000e+00 : f32
      %88 = vector.broadcast %cst_28 : f32 to vector<1x512xf32>
      %89 = tpu.concatenate %83, %87, %88 in 0 : vector<6x512xf32>, vector<1x512xf32>, vector<1x512xf32> -> vector<8x512xf32>
      %90 = vector.extract_strided_slice %89 {offsets = [0, 0], sizes = [7, 512], strides = [1, 1]} : vector<8x512xf32> to vector<7x512xf32>
      %c0_29 = arith.constant 0 : index
      %c0_30 = arith.constant 0 : index
      %c0_31 = arith.constant 0 : index
      %91 = vector.load %arg6[%c0_29, %c0_30, %c0_31] : memref<1x7x512xf32, #tpu.memory_space<vmem>>, vector<1x7x512xf32>
      %92 = vector.shape_cast %91 : vector<1x7x512xf32> to vector<7x512xf32>
      %93 = vector.shape_cast %90 : vector<7x512xf32> to vector<1x7x512xf32>
      tpu.vector_store %arg6[%c0_29, %c0_30, %c0_31], %93 {strides = array<i32>} : memref<1x7x512xf32, #tpu.memory_space<vmem>>, vector<1x7x512xf32>,
      %c0_32 = arith.constant 0 : index
      %c0_33 = arith.constant 0 : index
      %94 = vector.load %arg5[%c0_32, %c0_33] : memref<40x128xf32, #tpu.memory_space<vmem>>, vector<32x8xf32>
      %cst_34 = arith.constant dense<0.000000e+00> : vector<32x512xf32>
      %95 = tpu.matmul %94, %89, %cst_34 {dimension_numbers = #tpu.dot_dimension_numbers<[1], [0], [0], [1], [0, 0, 1, 1], [], []>} : vector<32x8xf32>, vector<8x512xf32>, vector<32x512xf32> -> vector<32x512xf32>
      %c0_35 = arith.constant 0 : index
      %c12 = arith.constant 12 : index
      %96 = vector.load %arg5[%c0_35, %c12] : memref<40x128xf32, #tpu.memory_space<vmem>>, vector<32x1xf32>
      %c0_36 = arith.constant 0 : index
      %c8 = arith.constant 8 : index
      %97 = vector.load %arg5[%c0_36, %c8] : memref<40x128xf32, #tpu.memory_space<vmem>>, vector<32x4xf32>
      %98 = vector.extract_strided_slice %97 {offsets = [0, 0], sizes = [32, 1], strides = [1, 1]} : vector<32x4xf32> to vector<32x1xf32>
      %99 = arith.index_cast %arg0 : i32 to index
      %c8_37 = arith.constant 8 : index
      %100 = memref.load %arg2[%99, %c8_37] : memref<2x16xf32, #tpu.memory_space<smem>>
      %101 = vector.broadcast %100 : f32 to vector<32x1xf32>
      %102 = arith.mulf %98, %101 : vector<32x1xf32>
      %103 = arith.addf %96, %102 : vector<32x1xf32>
      %104 = vector.extract_strided_slice %97 {offsets = [0, 1], sizes = [32, 1], strides = [1, 1]} : vector<32x4xf32> to vector<32x1xf32>
      %105 = arith.index_cast %arg0 : i32 to index
      %c9 = arith.constant 9 : index
      %106 = memref.load %arg2[%105, %c9] : memref<2x16xf32, #tpu.memory_space<smem>>
      %107 = vector.broadcast %106 : f32 to vector<32x1xf32>
      %108 = arith.mulf %104, %107 : vector<32x1xf32>
      %109 = arith.addf %103, %108 : vector<32x1xf32>
      %110 = vector.extract_strided_slice %97 {offsets = [0, 2], sizes = [32, 1], strides = [1, 1]} : vector<32x4xf32> to vector<32x1xf32>
      %111 = arith.index_cast %arg0 : i32 to index
      %c10 = arith.constant 10 : index
      %112 = memref.load %arg2[%111, %c10] : memref<2x16xf32, #tpu.memory_space<smem>>
      %113 = vector.broadcast %112 : f32 to vector<32x1xf32>
      %114 = arith.mulf %110, %113 : vector<32x1xf32>
      %115 = arith.addf %109, %114 : vector<32x1xf32>
      %116 = vector.extract_strided_slice %97 {offsets = [0, 3], sizes = [32, 1], strides = [1, 1]} : vector<32x4xf32> to vector<32x1xf32>
      %117 = arith.index_cast %arg0 : i32 to index
      %c11 = arith.constant 11 : index
      %118 = memref.load %arg2[%117, %c11] : memref<2x16xf32, #tpu.memory_space<smem>>
      %119 = vector.broadcast %118 : f32 to vector<32x1xf32>
      %120 = arith.mulf %116, %119 : vector<32x1xf32>
      %121 = arith.addf %115, %120 : vector<32x1xf32>
      %122 = vector.broadcast %121 : vector<32x1xf32> to vector<32x512xf32>
      %123 = arith.addf %95, %122 : vector<32x512xf32>
      %cst_38 = arith.constant 0.000000e+00 : f32
      %124 = vector.broadcast %cst_38 : f32 to vector<32x512xf32>
      %125 = arith.maximumf %123, %124 : vector<32x512xf32>
      %c32 = arith.constant 32 : index
      %c0_39 = arith.constant 0 : index
      %126 = vector.load %arg5[%c32, %c0_39] : memref<40x128xf32, #tpu.memory_space<vmem>>, vector<1x32xf32>
      %c33 = arith.constant 33 : index
      %c0_40 = arith.constant 0 : index
      %127 = vector.load %arg5[%c33, %c0_40] : memref<40x128xf32, #tpu.memory_space<vmem>>, vector<1x1xf32>
      %cst_41 = arith.constant dense<0.000000e+00> : vector<1x512xf32>
      %128 = tpu.matmul %126, %125, %cst_41 {dimension_numbers = #tpu.dot_dimension_numbers<[1], [0], [0], [1], [0, 0, 1, 1], [], []>} : vector<1x32xf32>, vector<32x512xf32>, vector<1x512xf32> -> vector<1x512xf32>
      %129 = vector.broadcast %127 : vector<1x1xf32> to vector<1x512xf32>
      %130 = arith.addf %128, %129 : vector<1x512xf32>
      %c0_42 = arith.constant 0 : index
      %c0_43 = arith.constant 0 : index
      %c0_44 = arith.constant 0 : index
      %131 = vector.load %arg7[%c0_42, %c0_43, %c0_44] : memref<1x1x512xf32, #tpu.memory_space<vmem>>, vector<1x1x512xf32>
      %132 = vector.shape_cast %131 : vector<1x1x512xf32> to vector<1x512xf32>
      %133 = vector.shape_cast %130 : vector<1x512xf32> to vector<1x1x512xf32>
      tpu.vector_store %arg7[%c0_42, %c0_43, %c0_44], %133 {strides = array<i32>} : memref<1x1x512xf32, #tpu.memory_space<vmem>>, vector<1x1x512xf32>,
      %cst_45 = arith.constant dense<0.000000e+00> : vector<32xf32>
      %134 = vector.multi_reduction <add>, %125, %cst_45 [1] : vector<32x512xf32> to vector<32xf32>
      %135 = vector.shape_cast %134 : vector<32xf32> to vector<32x1xf32>
      %cst_46 = arith.constant 5.120000e+02 : f32
      %136 = vector.broadcast %cst_46 : f32 to vector<32x1xf32>
      %137 = arith.divf %135, %136 : vector<32x1xf32>
      %138 = tpu.transpose %137, [1, 0] : vector<32x1xf32> -> vector<1x32xf32>
      %c0_47 = arith.constant 0 : index
      %c16 = arith.constant 16 : index
      %139 = vector.load %arg5[%c0_47, %c16] : memref<40x128xf32, #tpu.memory_space<vmem>>, vector<32x14xf32>
      %c34 = arith.constant 34 : index
      %c0_48 = arith.constant 0 : index
      %140 = vector.load %arg5[%c34, %c0_48] : memref<40x128xf32, #tpu.memory_space<vmem>>, vector<1x14xf32>
      %cst_49 = arith.constant dense<0.000000e+00> : vector<1x14xf32>
      %141 = tpu.matmul %138, %139, %cst_49 {dimension_numbers = #tpu.dot_dimension_numbers<[1], [0], [0], [1], [0, 0, 1, 1], [], []>} : vector<1x32xf32>, vector<32x14xf32>, vector<1x14xf32> -> vector<1x14xf32>
      %142 = arith.addf %141, %140 : vector<1x14xf32>
      %c0_50 = arith.constant 0 : index
      %c0_51 = arith.constant 0 : index
      %c0_52 = arith.constant 0 : index
      %143 = vector.load %arg8[%c0_50, %c0_51, %c0_52] : memref<1x1x14xf32, #tpu.memory_space<vmem>>, vector<1x1x14xf32>
      %144 = vector.shape_cast %143 : vector<1x1x14xf32> to vector<1x14xf32>
      %145 = vector.shape_cast %142 : vector<1x14xf32> to vector<1x1x14xf32>
      tpu.vector_store %arg8[%c0_50, %c0_51, %c0_52], %145 {strides = array<i32>} : memref<1x1x14xf32, #tpu.memory_space<vmem>>, vector<1x1x14xf32>,
    } else {
    }
    return
  }
  func.func @transform_0(%arg0: i32, %arg1: i32, %arg2: memref<2x16xf32, #tpu.memory_space<smem>>) -> (i32, i32, i32) {
    %c0_i32 = arith.constant 0 : i32
    %c0_i32_0 = arith.constant 0 : i32
    return %arg0, %c0_i32, %arg1 : i32, i32, i32
  }
  func.func @transform_1(%arg0: i32, %arg1: i32, %arg2: memref<2x16xf32, #tpu.memory_space<smem>>) -> (i32, i32, i32) {
    %c0_i32 = arith.constant 0 : i32
    %c0_i32_0 = arith.constant 0 : i32
    return %arg0, %c0_i32, %arg1 : i32, i32, i32
  }
  func.func @transform_2(%arg0: i32, %arg1: i32, %arg2: memref<2x16xf32, #tpu.memory_space<smem>>) -> (i32, i32) {
    %c0_i32 = arith.constant 0 : i32
    %c0_i32_0 = arith.constant 0 : i32
    %c0_i32_1 = arith.constant 0 : i32
    return %c0_i32, %c0_i32_0 : i32, i32
  }
  func.func @transform_3(%arg0: i32, %arg1: i32, %arg2: memref<2x16xf32, #tpu.memory_space<smem>>) -> (i32, i32, i32) {
    %c0_i32 = arith.constant 0 : i32
    %c0_i32_0 = arith.constant 0 : i32
    %c0_i32_1 = arith.constant 0 : i32
    return %arg0, %c0_i32, %c0_i32_0 : i32, i32, i32
  }
  func.func @transform_4(%arg0: i32, %arg1: i32, %arg2: memref<2x16xf32, #tpu.memory_space<smem>>) -> (i32, i32, i32) {
    %c0_i32 = arith.constant 0 : i32
    %c0_i32_0 = arith.constant 0 : i32
    %c0_i32_1 = arith.constant 0 : i32
    return %arg0, %c0_i32, %c0_i32_0 : i32, i32, i32
  }
  func.func @transform_5(%arg0: i32, %arg1: i32, %arg2: memref<2x16xf32, #tpu.memory_space<smem>>) -> (i32, i32, i32) {
    %c0_i32 = arith.constant 0 : i32
    %c0_i32_0 = arith.constant 0 : i32
    %c0_i32_1 = arith.constant 0 : i32
    return %arg0, %c0_i32, %c0_i32_0 : i32, i32, i32
  }
}

</mosaic_0001>

<bundles_post_ra>
// kernel: tpu_custom_call.1
= control target key start
LH: loop header
LB: loop body
LE: loop exit
PB: predicated region body
PF: predicated region fallthrough
CT: control target
= control target key end

     0   :  { %s2490_s24 = smov [#allocation4]   ;;  %s3431_s0 = inlined_call_operand.vmem [shape: f32[2,16], index: 0, kind: input, shape index: {}]   ;;  %s3432_s1 = inlined_call_operand.vmem [shape: f32[2,3,256], index: 1, kind: input, shape index: {}]   ;;  %s3433_s2 = inlined_call_operand.vmem [shape: f32[2,3,256], index: 2, kind: input, shape index: {}]   ;;  %s3434_s3 = inlined_call_operand.vmem [shape: f32[40,128], index: 3, kind: input, shape index: {}]   ;;  %s3435_s4 = inlined_call_operand.vmem [shape: f32[2,7,512], index: 4, kind: output, shape index: {0}]   ;;  %s3436_s5 = inlined_call_operand.hbm [shape: f32[2,1,512], index: 5, kind: output, shape index: {1}]   ;;  %s3437_s6 = inlined_call_operand.hbm [shape: f32[2,1,14], index: 6, kind: output, shape index: {2}]  }
   0x1   :  { %s13_s23 = sshll.u32 %s3431_s0, 4  ;;  %s14_s23 = int_to_ptr.vmem [resolvable:$true] %s13_s23 }
   0x2   :  { %16 = dma.vmem_to_smem %s14_s23, 32, %s2490_s24, [#allocation3] }
   0x3   :  { %2456 = dma.done.wait [#allocation3], 32 }
   0x4   :  { %2457 = vsyncadd [#allocation3], 4294967264 }
   0x5   :  { %19 = sfence }
   0x6   :  { %20 = vsyncpa [#allocation6], 0 }
   0x7   :  { %22 = vsyncpa [#allocation6 + $0x1], 0 }
   0x8   :  { %23 = vsyncpa [#allocation8], 0 }
   0x9   :  { %25 = vsyncpa [#allocation8 + $0x1], 0  ;;  %s2539_s25 = smov 0   ;;  %s2541_s26 = smov 0  }
   0xa   :  { %s2543_s27 = smov 0   ;;  %s2545_s28 = smov 0  }
   0xb   :  { %s2547_s29 = smov 0   ;;  %s2549_s0 = smov 0  }
   0xc LB: > { %3440 = sst [smem:[#allocation12_spill]] %s2484_s29  ;;  %s1955_s30 = sadd.s32 4294967295, %s2488_s0   ;;  %s2488_s0 = sphi %s2549_s0, %s31_s0   ;;  %s2484_s29 = sphi %s2547_s29, %s3518_s29   ;;  %s2480_s28 = sphi %s2545_s28, %s3517_s28   ;;  %s2476_s27 = sphi %s2543_s27, %s3521_s27   ;;  %s2472_s26 = sphi %s2541_s26, %s3520_s26   ;;  %s2468_s25 = sphi %s2539_s25, %s3519_s25  }
   0xd   : > { %s1956_s7 = sadd.s32 4294967294, %s2488_s0   ;;  %s43_s8 = sadd.s32 1, %s2484_s29 }
   0xe   : > { %s153_s9 = sadd.s32 1, %s2476_s27  ;;  %p45_p0 = scmp.ge.s32.totalorder %s43_s8, 2 }
   0xf   : > { %p163_p1 = scmp.ne.s32.totalorder %s2476_s27, %s2472_s26  ;;  %p164_p2 = scmp.eq.s32.totalorder %s1955_s30, 1 }
  0x10   : > { %p169_p3 = scmp.ne.s32.totalorder %s2472_s26, %s2468_s25  ;;  %s3523_s8 = smov (%p45_p0, %s43_s8), 0 }
  0x11   : > { %3441 = sst [smem:[#allocation13_spill]] %s3523_s8  ;;  %p2579_p4 = por %p164_p2, %p163_p1 }
  0x12   : > { %p170_p5 = scmp.eq.s32.totalorder %s1956_s7, 1  ;;  %s150_s11 = ssub.s32 %s2484_s29, %s3523_s8 }
  0x13   : > { %p1959_p6 = scmp.ge.s32.totalorder %s2488_s0, 1  ;;  %p151_p7 = scmp.eq.s32.totalorder %s150_s11, 0 }
  0x14   : > { %p2586_p8 = por %p170_p5, %p169_p3  ;;  %p243_p9 = scmp.lt.s32.totalorder %s2488_s0, 3 }
  0x15   : > { %s2592_s13 = scalar_select %p151_p7, %s2476_s27, %s153_s9  }
  0x16   : > { %p244_p10 = pnand %p1959_p6, %p243_p9 }
  0x17   : > { %p294_p11 = scmp.lt.s32.totalorder (!%p244_p10), %s2480_s28, 1  ;;  %s2596_s14 = sshll.u32 (!%p244_p10), %s2480_s28, 7 }
  0x18   : > { %247 = sbr.rel (%p244_p10) target bundleno = 1362 (0x552), region = 32  ;;  %s329_s15 = sld [smem:[#allocation4 + %s2596_s14]] (!%p244_p10) }
  0x19   : > { %s330_s16 = sadd.s32 (!%p244_p10), 1, %s2596_s14  ;;  %s332_s19 = sadd.s32 (!%p244_p10), 2, %s2596_s14 }
  0x1a   : > { %s331_s18 = sld [smem:[#allocation4 + %s330_s16]] (!%p244_p10)  ;;  %s334_s30 = sadd.s32 (!%p244_p10), 3, %s2596_s14 }
  0x1b   : > { %s333_s21 = sld [smem:[#allocation4 + %s332_s19]] (!%p244_p10)  ;;  %s336_s7 = sadd.s32 (!%p244_p10), 4, %s2596_s14 }
  0x1c   : > { %s335_s9 = sld [smem:[#allocation4 + %s334_s30]] (!%p244_p10)  ;;  %s338_s11 = sadd.s32 (!%p244_p10), 5, %s2596_s14 }
  0x1d   : > { %s2601_s17 = scalar_select %p294_p11, %s2480_s28, 1  ;;  %v2491_v34 = vmov 0  }
  0x1e   : > { %v341_v1 = vstv %s329_s15  ;;  %s337_s8 = sld [smem:[#allocation4 + %s336_s7]]  ;;  %2338 = vset.pattern.permute.xlu1 %v2491_v34  ;;  %2339 = vset.pattern.permute.xlu2 %v2491_v34  ;;  %s1278_s16 = sadd.s32 8, %s2596_s14 }
  0x1f   : > { %s2259_s20 = sshll.u32 %s2601_s17, 3  ;;  %s339_s29 = sld [smem:[#allocation4 + %s338_s11]] }
  0x20   : > { %s301_s24 = scalar_lea.vmem %s3432_s1, %s2259_s20  ;;  %v348_v2 = vstv %s331_s18  ;;  %s311_s15 = scalar_lea.vmem %s3433_s2, %s2259_s20 }
  0x21   : > { %v340_v0 = vld [vmem:[%s301_s24] sm:$0x77]  ;;  %v355_v4 = vstv %s333_s21  ;;  %s2898_s18 = sld [smem:[#allocation4 + %s1278_s16]]  ;;  %s1332_s19 = sadd.s32 10, %s2596_s14 }
  0x22   : > { %992 = vst [vmem:[#allocation1] ss:$2 sm:$0xff] %v340_v0  ;;  %v342_v3 = vsub.f32 %v340_v0, %v341_v1  ;;  %v349_v5 = vsub.f32 %v340_v0, %v348_v2  ;;  %v356_v6 = vsub.f32 %v340_v0, %v355_v4  ;;  %v343_v7 = vstv %s335_s9  ;;  %s2948_s22 = sld [smem:[#allocation4 + %s1332_s19]]  ;;  %s2493_s23 = smov 4  }
  0x23   : > { %s1305_s24 = sadd.s32 9, %s2596_s14  ;;  %s2494_s7 = smov 2  }
  0x24   : > { %v344_v8 = vmul.f32 %v343_v7, %v342_v3  ;;  %v350_v9 = vstv %s337_s8  ;;  %s3012_s30 = sld [smem:[#allocation4 + %s1305_s24]]  ;;  %s2495_s16 = smov 3  }
  0x25   : > { %v351_v10 = vmul.f32 %v350_v9, %v349_v5  ;;  %v357_v11 = vstv %s339_s29  ;;  %v441_v5 = vlaneseq  ;;  %s2496_s20 = smov 1   ;;  %s2261_s21 = sshll.u32 %s2601_s17, 5 }
  0x26   : > { %v345_v12 = vfloor.f32 %v344_v8  ;;  %v358_v13 = vmul.f32 %v357_v11, %v356_v6  ;;  %s2499_s24 = smov 112   ;;  %s3370_s29 = sand.u32 1, %s2472_s26  }
  0x27   : > { %v352_v14 = vfloor.f32 %v351_v10  ;;  %v2625_v8 = vand.u32 127, %v441_v5  ;;  %s2256_s8 = sshll.u32 %s2480_s28, 2  ;;  %s1776_s17 = scalar_lea.sflag [#allocation6], %s3370_s29 }
  0x28   : > { %v346_v15 = vmax.f32 %v345_v12, 0.0  ;;  %v359_v16 = vfloor.f32 %v358_v13 }
  0x29   : > { %v353_v17 = vmax.f32 %v352_v14, 0.0  ;;  %v2629_v9 = vadd.s32 128, %v2625_v8  ;;  %v2632_v12 = vadd.s32 256, %v2625_v8  ;;  %v2635_v13 = vadd.s32 384, %v2625_v8 }
  0x2a   : > { %v347_v18 = vmin.f32 %v346_v15, 7.0  ;;  %v360_v19 = vmax.f32 %v359_v16, 0.0  ;;  %v3448_v16 = vmov 0 }
  0x2b   : > { %v354_v20 = vmin.f32 %v353_v17, 7.0  ;;  %v3450_v17 = vmov 0 }
  0x2c   : > { %v361_v21 = vmin.f32 %v360_v19, 7.0  ;;  %v362_v22 = vmul.f32 64.0, %v347_v18 }
  0x2d   : > { %v363_v23 = vmul.f32 8.0, %v354_v20  ;;  %v3452_v20 = vmov 0 }
  0x2e   : > { %v1969_v25 = vrot.slane %v361_v21, 10  ;;  %v3454_v21 = vmov 0 }
  0x2f   : > { %v1968_v24 = vrot.slane %v363_v23, 9  ;;  %v3458_v23 = vmov 0 }
  0x31   : > { %v368_v26 = vadd.f32 %v1968_v24, %v362_v22  ;;  %v3456_v22 = vmov 0 }
  0x33   : > { %v373_v27 = vadd.f32 %v1969_v25, %v368_v26 }
  0x35   : > { %vm2262_vm0 = vcmp.lt.s32.totalorder %v373_v27, 0  ;;  %v2263_v28 = vceil.f32 %v373_v27  ;;  %v2264_v29 = vfloor.f32 %v373_v27 }
  0x37   : > { %v2265_v30 = vsel %vm2262_vm0, %v2263_v28, %v2264_v29  ;;  %v3464_v28 = vmov 0  ;;  %v3466_v29 = vmov 0 }
  0x38   : > { %v2266_v31 = vcvt.f32.s32 %v2265_v30 }
  0x3a   : > { %v375_v32 = vperm.slane %v2266_v31, 0  ;;  %v376_v33 = vperm.slane %v2266_v31, 4 }
  0x3c   : > { %377 = vxpose.xlu0.b32.start.end [1/1] (short) %v375_v32, 128 }
  0xbc   : > { %409 = vxpose.xlu0.b32.start.end [1/1] (short) %v376_v33, 128  ;;  %v3470_v33 = vmov 0 }
  0xe0   : > { %v393_v35 = vpop.trf.xlu0 }
  0xe8   : > { %v2615_v36 = vpop.trf.xlu0 }
  0xf0   : > { %v395_v37 = vpop.trf.xlu0 }
  0xf8   : > { %v396_v38 = vpop.trf.xlu0 }
 0x100   : > { %v397_v39 = vpop.trf.xlu0 }
 0x101   : > { %459 = vperm.xlu1 %2338, %v397_v39   ;;  %v3476_v39 = vmov 0 }
 0x108   : > { %v398_v40 = vpop.trf.xlu0 }
 0x109   : > { %462 = vperm.xlu2 %2339, %v398_v40   ;;  %v3478_v40 = vmov 0 }
 0x110   : > { %v399_v41 = vpop.trf.xlu0 }
 0x118   : > { %v400_v42 = vpop.trf.xlu0 }
 0x120   : > { %v401_v43 = vpop.trf.xlu0 }
 0x123   : > { %2353 = vset.pattern.permute.xlu0 %v2491_v34 }
 0x128   : > { %v402_v44 = vpop.trf.xlu0 }
 0x130   : > { %v403_v45 = vpop.trf.xlu0 }
 0x138   : > { %v404_v46 = vpop.trf.xlu0 }
 0x140   : > { %v405_v47 = vpop.trf.xlu0 }
 0x148   : > { %v406_v48 = vpop.trf.xlu0 }
 0x150   : > { %v407_v49 = vpop.trf.xlu0 }
 0x158   : > { %v408_v50 = vpop.trf.xlu0 }
 0x160   : > { %v425_v51 = vpop.trf.xlu0 }
 0x163   : > { %v2620_v3 = vpop.permute.xlu2 %462 }
 0x168   : > { %v2618_v52 = vpop.trf.xlu0 }
 0x170   : > { %v427_v53 = vpop.trf.xlu0 }
 0x173   : > { %v2622_v6 = vpop.permute.xlu1 %459 }
 0x178   : > { %v428_v54 = vpop.trf.xlu0 }
 0x180   : > { %v429_v55 = vpop.trf.xlu0 }
 0x181   : > { %507 = vperm.xlu1 %2338, %v429_v55   ;;  %v2814_v55 = vld.sshfl [vmem:[#allocation1] sm:$0xff pattern:$0x75316420] }
 0x188   : > { %v430_v56 = vpop.trf.xlu0 }
 0x189   : > { %465 = vperm.xlu1 %2338, %v399_v41   ;;  %510 = vperm.xlu2 %2339, %v430_v56   ;;  %v2819_v56 = vld.sshfl [vmem:[#allocation1 + $0x8] sm:$0xff pattern:$0x75316420] }
 0x190   : > { %v431_v57 = vpop.trf.xlu0 }
 0x191   : > { %468 = vperm.xlu2 %2339, %v400_v42   ;;  %513 = vperm.xlu1 %2338, %v431_v57  }
 0x198   : > { %v432_v58 = vpop.trf.xlu0 }
 0x199   : > { %471 = vperm.xlu1 %2338, %v401_v43   ;;  %516 = vperm.xlu2 %2339, %v432_v58   ;;  %v3480_v43 = vmov 0 }
 0x1a0   : > { %v433_v59 = vpop.trf.xlu0 }
 0x1a1   : > { %474 = vperm.xlu2 %2339, %v402_v44   ;;  %519 = vperm.xlu1 %2338, %v433_v59   ;;  %v3482_v44 = vmov 0 }
 0x1a8   : > { %v434_v60 = vpop.trf.xlu0 }
 0x1a9   : > { %477 = vperm.xlu1 %2338, %v403_v45   ;;  %522 = vperm.xlu2 %2339, %v434_v60  }
 0x1b0   : > { %v435_v61 = vpop.trf.xlu0 }
 0x1b1   : > { %480 = vperm.xlu2 %2339, %v404_v46   ;;  %525 = vperm.xlu1 %2338, %v435_v61  }
 0x1b8   : > { %v436_v62 = vpop.trf.xlu0 }
 0x1b9   : > { %483 = vperm.xlu1 %2338, %v405_v47   ;;  %528 = vperm.xlu2 %2339, %v436_v62   ;;  %v3484_v47 = vmov 0 }
 0x1c0   : > { %v437_v63 = vpop.trf.xlu0 }
 0x1c1   : > { %486 = vperm.xlu2 %2339, %v406_v48   ;;  %531 = vperm.xlu1 %2338, %v437_v63   ;;  %v3486_v48 = vmov 0 }
 0x1c8   : > { %v438_v0 = vpop.trf.xlu0 }
 0x1c9   : > { %489 = vperm.xlu1 %2338, %v407_v49   ;;  %534 = vperm.xlu2 %2339, %v438_v0  }
 0x1d0   : > { %v439_v1 = vpop.trf.xlu0 }
 0x1d1   : > { %492 = vperm.xlu1 %2338, %v408_v50   ;;  %537 = vperm.xlu2 %2339, %v439_v1  }
 0x1d8   : > { %v440_v2 = vpop.trf.xlu0 }
 0x1d9   : > { %453 = vperm.xlu1 %2338, %v395_v37   ;;  %540 = vperm.xlu2 %2339, %v440_v2  }
 0x1e1   : > { %501 = vperm.xlu1 %2338, %v427_v53   ;;  %456 = vperm.xlu2 %2339, %v396_v38   ;;  %v2492_v53 = vmov 1.0|1.0  }
 0x1e3   : > { %v511_v4 = vpop.permute.xlu2 %510 }
 0x1e4   : > { %vm626_vm2 = vcmp.eq.s32.totalorder %v2625_v8, %v511_v4  ;;  %vm627_vm5 = vcmp.eq.s32.totalorder %v2629_v9, %v511_v4  ;;  %vm628_vm9 = vcmp.eq.s32.totalorder %v2632_v12, %v511_v4  ;;  %vm629_vm11 = vcmp.eq.s32.totalorder %v2635_v13, %v511_v4 }
 0x1e9   : > { %447 = vperm.xlu1 %2338, %v393_v35   ;;  %504 = vperm.xlu2 %2339, %v428_v54   ;;  %v3472_v35 = vmov 0  ;;  %v990_v54 = vld [vmem:[%s311_s15] sm:$0x77]  ;;  %s1359_s15 = sadd.s32 11, %s2596_s14 }
 0x1ea   : > { %999 = vst [vmem:[#allocation1] ss:$2 sm:$0xff] %v990_v54  ;;  %s1360_s14 = sld [smem:[#allocation4 + %s1359_s15]]  ;;  %s1960_s15 = sshll.u32 %s3370_s29, 2 }
 0x1eb   : > { %v469_v7 = vpop.permute.xlu2 %468  ;;  %s286_s19 = scalar_lea.vmem [#allocation5], %s1960_s15 }
 0x1ec   : > { %vm570_vm14 = vcmp.eq.s32.totalorder %v2625_v8, %v469_v7 }
 0x1f1   : > { %495 = vperm.xlu1 %2338, %v425_v51   ;;  %450 = vperm.xlu2 %2339, %v2615_v36   ;;  %v3474_v36 = vmov 0  ;;  %v1000_v58 = vld.sshfl [vmem:[#allocation1] sm:$0xff pattern:$0x75316420] }
 0x1f2   : > { %v1001_v59 = vld.sshfl [vmem:[#allocation1 + $0x8] sm:$0xff pattern:$0x75316420] }
 0x1f3   : > { %v508_v10 = vpop.permute.xlu1 %507  ;;  %v517_v11 = vpop.permute.xlu2 %516  ;;  %v1004_v62 = vpack.c.bf16 %v1001_v59, %v1000_v58 }
 0x1f4   : > { %vm622_vm1 = vcmp.eq.s32.totalorder %v2625_v8, %v508_v10  ;;  %vm623_vm3 = vcmp.eq.s32.totalorder %v2629_v9, %v508_v10  ;;  %vm624_vm6 = vcmp.eq.s32.totalorder %v2632_v12, %v508_v10  ;;  %vm625_vm7 = vcmp.eq.s32.totalorder %v2635_v13, %v508_v10 }
 0x1f5   : > { %vm2640_vm4 = vmpackc.low %vm626_vm2, %vm622_vm1  ;;  %vm571_vm1 = vcmp.eq.s32.totalorder %v2629_v9, %v469_v7  ;;  %v1013_v63 = vunpack.c.l.b16 %v1004_v62  ;;  %v1014_v1 = vunpack.c.h.b16 %v1004_v62 }
 0x1f6   : > { %vm2647_vm8 = vmpackc.low %vm627_vm5, %vm623_vm3 }
 0x1f7   : > { %vm2652_vm10 = vmpackc.low %vm628_vm9, %vm624_vm6  ;;  %vm572_vm6 = vcmp.eq.s32.totalorder %v2632_v12, %v469_v7  ;;  %vm573_vm9 = vcmp.eq.s32.totalorder %v2635_v13, %v469_v7  ;;  %v1015_v2 = vpack.c.b16 %v1013_v63, %v1013_v63  ;;  %v997_v7 = vpack.c.bf16 %v2819_v56, %v2814_v55 }
 0x1f8   : > { %v3449_v16 = vsel %vm2652_vm10, 4294967295, %v3448_v16  ;;  %vm2657_vm12 = vmpackc.low %vm629_vm11, %vm625_vm7  ;;  %v1016_v10 = vpack.c.b16 %v1014_v1, %v1014_v1 }
 0x1f9   : > { %v3451_v17 = vsel %vm2657_vm12, 4294967295, %v3450_v17  ;;  %498 = vperm.xlu2 %2339, %v2618_v52   ;;  %vm636_vm12 = vcmp.eq.s32.totalorder %v2632_v12, %v517_v11  ;;  %v1021_v14 = vshll.u32 %v1015_v2, 16 }
 0x1fb   : > { %v466_v18 = vpop.permute.xlu1 %465  ;;  %v475_v19 = vpop.permute.xlu2 %474  ;;  %v1023_v26 = vrot.slane %v1021_v14, 7 }
 0x1fc   : > { %vm566_vm13 = vcmp.eq.s32.totalorder %v2625_v8, %v466_v18  ;;  %vm567_vm15 = vcmp.eq.s32.totalorder %v2629_v9, %v466_v18  ;;  %vm568_vm2 = vcmp.eq.s32.totalorder %v2632_v12, %v466_v18  ;;  %vm569_vm3 = vcmp.eq.s32.totalorder %v2635_v13, %v466_v18 }
 0x1fd   : > { %vm2665_vm0 = vmpackc.low %vm570_vm14, %vm566_vm13  ;;  %vm634_vm14 = vcmp.eq.s32.totalorder %v2625_v8, %v517_v11  ;;  %v1006_v18 = vunpack.c.l.b16 %v997_v7 }
 0x1fe   : > { %v3453_v20 = vsel %vm2665_vm0, 4294967295, %v3452_v20  ;;  %vm2672_vm5 = vmpackc.low %vm571_vm1, %vm567_vm15 }
 0x1ff   : > { %v3455_v21 = vsel %vm2672_vm5, 4294967295, %v3454_v21  ;;  %vm2677_vm7 = vmpackc.low %vm572_vm6, %vm568_vm2  ;;  %vm635_vm2 = vcmp.eq.s32.totalorder %v2629_v9, %v517_v11 }
 0x200   : > { %v3457_v22 = vsel %vm2677_vm7, 4294967295, %v3456_v22  ;;  %vm2682_vm11 = vmpackc.low %vm573_vm9, %vm569_vm3 }
 0x201   : > { %v3459_v23 = vsel %vm2682_vm11, 4294967295, %v3458_v23 }
 0x203   : > { %v514_v24 = vpop.permute.xlu1 %513  ;;  %v2686_v25 = vpop.permute.xlu2 %522 }
 0x204   : > { %vm630_vm13 = vcmp.eq.s32.totalorder %v2625_v8, %v514_v24  ;;  %vm631_vm15 = vcmp.eq.s32.totalorder %v2629_v9, %v514_v24  ;;  %vm632_vm3 = vcmp.eq.s32.totalorder %v2632_v12, %v514_v24  ;;  %vm633_vm6 = vcmp.eq.s32.totalorder %v2635_v13, %v514_v24 }
 0x205   : > { %vm2691_vm1 = vmpackc.low %vm634_vm14, %vm630_vm13  ;;  %vm637_vm13 = vcmp.eq.s32.totalorder %v2635_v13, %v517_v11  ;;  %v1018_v11 = vshrl.u32 %v1015_v2, 16  ;;  %v1029_v24 = vshll.u32 %v1016_v10, 16 }
 0x206   : > { %vm2698_vm9 = vmpackc.low %vm635_vm2, %vm631_vm15  ;;  %vm578_vm2 = vcmp.eq.s32.totalorder %v2625_v8, %v475_v19 }
 0x207   : > { %vm2703_vm10 = vmpackc.low %vm636_vm12, %vm632_vm3  ;;  %vm579_vm12 = vcmp.eq.s32.totalorder %v2629_v9, %v475_v19 }
 0x208   : > { %v3465_v28 = vsel %vm2703_vm10, 4294967295, %v3464_v28  ;;  %vm2708_vm14 = vmpackc.low %vm637_vm13, %vm633_vm6 }
 0x209   : > { %v3467_v29 = vsel %vm2708_vm14, 4294967295, %v3466_v29  ;;  %vm580_vm14 = vcmp.eq.s32.totalorder %v2632_v12, %v475_v19 }
 0x20b   : > { %v472_v30 = vpop.permute.xlu1 %471  ;;  %v2712_v31 = vpop.permute.xlu2 %480 }
 0x20c   : > { %vm574_vm15 = vcmp.eq.s32.totalorder %v2625_v8, %v472_v30  ;;  %vm575_vm11 = vcmp.eq.s32.totalorder %v2629_v9, %v472_v30  ;;  %vm576_vm3 = vcmp.eq.s32.totalorder %v2632_v12, %v472_v30  ;;  %vm577_vm6 = vcmp.eq.s32.totalorder %v2635_v13, %v472_v30 }
 0x20d   : > { %vm2717_vm7 = vmpackc.low %vm578_vm2, %vm574_vm15  ;;  %vm581_vm15 = vcmp.eq.s32.totalorder %v2635_v13, %v475_v19  ;;  %v1026_v19 = vshrl.u32 %v1016_v10, 16  ;;  %v1008_v30 = vpack.c.b16 %v1006_v18, %v1006_v18 }
 0x20e   : > { %vm2724_vm13 = vmpackc.low %vm579_vm12, %vm575_vm11  ;;  %vm644_vm12 = vcmp.eq.s32.totalorder %v2632_v12, %v2686_v25 }
 0x20f   : > { %v3471_v33 = vsel %vm2724_vm13, 4294967295, %v3470_v33  ;;  %vm2729_vm10 = vmpackc.low %vm580_vm14, %vm576_vm3  ;;  %v1028_v32 = vrot.slane %v1026_v19, 6 }
 0x210   : > { %v3473_v35 = vsel %vm2729_vm10, 4294967295, %v3472_v35  ;;  %vm2734_vm2 = vmpackc.low %vm581_vm15, %vm577_vm6  ;;  %vm645_vm6 = vcmp.eq.s32.totalorder %v2635_v13, %v2686_v25 }
 0x211   : > { %v3475_v36 = vsel %vm2734_vm2, 4294967295, %v3474_v36 }
 0x213   : > { %v2738_v37 = vpop.permute.xlu1 %519  ;;  %v529_v38 = vpop.permute.xlu2 %528 }
 0x214   : > { %vm640_vm11 = vcmp.eq.s32.totalorder %v2632_v12, %v2738_v37  ;;  %vm641_vm14 = vcmp.eq.s32.totalorder %v2635_v13, %v2738_v37  ;;  %vm652_vm5 = vcmp.eq.s32.totalorder %v2632_v12, %v529_v38  ;;  %vm651_vm13 = vcmp.eq.s32.totalorder %v2629_v9, %v529_v38 }
 0x215   : > { %vm2746_vm3 = vmpackc.low %vm644_vm12, %vm640_vm11  ;;  %vm588_vm12 = vcmp.eq.s32.totalorder %v2632_v12, %v2712_v31 }
 0x216   : > { %v3477_v39 = vsel %vm2746_vm3, 4294967295, %v3476_v39  ;;  %vm2752_vm15 = vmpackc.low %vm645_vm6, %vm641_vm14  ;;  %vm589_vm14 = vcmp.eq.s32.totalorder %v2635_v13, %v2712_v31 }
 0x217   : > { %v3479_v40 = vsel %vm2752_vm15, 4294967295, %v3478_v40 }
 0x21b   : > { %v2756_v41 = vpop.permute.xlu1 %477  ;;  %v2758_v42 = vpop.permute.xlu2 %486 }
 0x21c   : > { %vm584_vm2 = vcmp.eq.s32.totalorder %v2632_v12, %v2756_v41  ;;  %vm585_vm11 = vcmp.eq.s32.totalorder %v2635_v13, %v2756_v41 }
 0x21d   : > { %vm2766_vm3 = vmpackc.low %vm588_vm12, %vm584_vm2  ;;  %vm653_vm12 = vcmp.eq.s32.totalorder %v2635_v13, %v529_v38 }
 0x21e   : > { %v3481_v43 = vsel %vm2766_vm3, 4294967295, %v3480_v43  ;;  %vm2772_vm6 = vmpackc.low %vm589_vm14, %vm585_vm11 }
 0x21f   : > { %v3483_v44 = vsel %vm2772_vm6, 4294967295, %v3482_v44  ;;  %vm650_vm6 = vcmp.eq.s32.totalorder %v2625_v8, %v529_v38  ;;  %v2946_v38 = vstv %s2898_s18  ;;  %s1793_s18 = scalar_lea.hbm %s3436_s5, %s2256_s8 }
 0x223   : > { %v526_v45 = vpop.permute.xlu1 %525  ;;  %v2776_v46 = vpop.permute.xlu2 %534 }
 0x224   : > { %vm648_vm15 = vcmp.eq.s32.totalorder %v2632_v12, %v526_v45  ;;  %vm649_vm10 = vcmp.eq.s32.totalorder %v2635_v13, %v526_v45 }
 0x225   : > { %vm2781_vm2 = vmpackc.low %vm652_vm5, %vm648_vm15 }
 0x226   : > { %v3485_v47 = vsel %vm2781_vm2, 4294967295, %v3484_v47  ;;  %vm2786_vm3 = vmpackc.low %vm653_vm12, %vm649_vm10 }
 0x227   : > { %v3487_v48 = vsel %vm2786_vm3, 4294967295, %v3486_v48 }
 0x22b   : > { %v2790_v49 = vpop.permute.xlu1 %483  ;;  %v2792_v50 = vpop.permute.xlu2 %537 }
 0x22c   : > { %vm662_vm5 = vcmp.eq.s32.totalorder %v2625_v8, %v2792_v50  ;;  %vm663_vm14 = vcmp.eq.s32.totalorder %v2629_v9, %v2792_v50 }
 0x233   : > { %v2799_v51 = vpop.permute.xlu1 %531  ;;  %v2801_v52 = vpop.permute.xlu2 %540 }
 0x234   : > { %vm666_vm10 = vcmp.eq.s32.totalorder %v2625_v8, %v2801_v52  ;;  %vm667_vm15 = vcmp.eq.s32.totalorder %v2629_v9, %v2801_v52  ;;  %vm654_vm3 = vcmp.eq.s32.totalorder %v2625_v8, %v2799_v51  ;;  %vm655_vm2 = vcmp.eq.s32.totalorder %v2629_v9, %v2799_v51 }
 0x235   : > { %vm2114_vm11 = vmpackc.low %vm666_vm10, %vm662_vm5  ;;  %vm658_vm5 = vcmp.eq.s32.totalorder %v2625_v8, %v2776_v46 }
 0x236   : > { %2115 = vmatpush.bf16.msk.msra.mxu1 %vm2114_vm11, %v2492_v53  ;;  %vm2146_vm12 = vmpackc.low %vm667_vm15, %vm663_vm14  ;;  %vm659_vm15 = vcmp.eq.s32.totalorder %v2629_v9, %v2776_v46  ;;  %vm646_vm14 = vcmp.eq.s32.totalorder %v2625_v8, %v526_v45 }
 0x237   : > { %2147 = vmatpush.bf16.msk.msra.mxu3 %vm2146_vm12, %v2492_v53  ;;  %vm2116_vm10 = vmpackc.low %vm658_vm5, %vm654_vm3  ;;  %vm647_vm12 = vcmp.eq.s32.totalorder %v2629_v9, %v526_v45  ;;  %vm638_vm5 = vcmp.eq.s32.totalorder %v2625_v8, %v2738_v37 }
 0x238   : > { %vm2148_vm11 = vmpackc.low %vm659_vm15, %vm655_vm2  ;;  %vm639_vm2 = vcmp.eq.s32.totalorder %v2629_v9, %v2738_v37  ;;  %v2943_v37 = vld [vmem:[%s3434_s3] sm:$0xff] }
 0x239   : > { %vm2118_vm0 = vmpackc.low %vm650_vm6, %vm646_vm14  ;;  %vm643_vm6 = vcmp.eq.s32.totalorder %v2629_v9, %v2686_v25 }
 0x23a   : > { %2117 = vmatpush.bf16.msk.msra.mxu1 %vm2116_vm10, %v2492_v53  ;;  %vm2150_vm3 = vmpackc.low %vm651_vm13, %vm647_vm12  ;;  %vm642_vm10 = vcmp.eq.s32.totalorder %v2625_v8, %v2686_v25  ;;  %v1020_v25 = vrot.slane %v1018_v11, 6 }
 0x23b   : > { %2149 = vmatpush.bf16.msk.msra.mxu3 %vm2148_vm11, %v2492_v53  ;;  %v2828_v57 = vpop.permute.xlu1 %489  ;;  %vm2120_vm15 = vmpackc.low %vm642_vm10, %vm638_vm5  ;;  %v2844_v60 = vpop.permute.xlu2 %456  ;;  %vm591_vm10 = vcmp.eq.s32.totalorder %v2629_v9, %v2790_v49 }
 0x23c   : > { %vm598_vm13 = vcmp.eq.s32.totalorder %v2625_v8, %v2828_v57 }
 0x23e   : > { %2119 = vmatpush.bf16.msk.msra.mxu1 %vm2118_vm0, %v2492_v53  ;;  %vm2152_vm0 = vmpackc.low %vm643_vm6, %vm639_vm2  ;;  %vm590_vm2 = vcmp.eq.s32.totalorder %v2625_v8, %v2790_v49 }
 0x23f   : > { %2151 = vmatpush.bf16.msk.msra.mxu3 %vm2150_vm3, %v2492_v53  ;;  %vm599_vm3 = vcmp.eq.s32.totalorder %v2629_v9, %v2828_v57 }
 0x242   : > { %2121 = vmatpush.bf16.msk.msra.mxu1 %vm2120_vm15, %v2492_v53  ;;  %vm594_vm15 = vcmp.eq.s32.totalorder %v2625_v8, %v2758_v42 }
 0x243   : > { %2153 = vmatpush.bf16.msk.msra.mxu3 %vm2152_vm0, %v2492_v53  ;;  %v2847_v61 = vpop.permute.xlu1 %492  ;;  %vm2100_vm6 = vmpackc.low %vm594_vm15, %vm590_vm2  ;;  %v2889_v4 = vpop.permute.xlu2 %504  ;;  %vm558_vm15 = vcmp.eq.s32.totalorder %v2625_v8, %v2622_v6 }
 0x244   : > { %vm602_vm11 = vcmp.eq.s32.totalorder %v2625_v8, %v2847_v61  ;;  %vm603_vm14 = vcmp.eq.s32.totalorder %v2629_v9, %v2847_v61 }
 0x245   : > { %vm2098_vm12 = vmpackc.low %vm602_vm11, %vm598_vm13  ;;  %vm583_vm13 = vcmp.eq.s32.totalorder %v2629_v9, %v2756_v41  ;;  %vm586_vm11 = vcmp.eq.s32.totalorder %v2625_v8, %v2712_v31 }
 0x246   : > { %2099 = vmatpush.bf16.msk.msra.mxu0 %vm2098_vm12, %v2492_v53  ;;  %2123 = vmatpush.bf16.msk.msra.mxu1 %vm2691_vm1, %v2492_v53  ;;  %vm2130_vm5 = vmpackc.low %vm603_vm14, %vm599_vm3  ;;  %vm595_vm1 = vcmp.eq.s32.totalorder %v2629_v9, %v2758_v42  ;;  %vm587_vm14 = vcmp.eq.s32.totalorder %v2629_v9, %v2712_v31  ;;  %vm618_vm3 = vcmp.eq.s32.totalorder %v2625_v8, %v2889_v4 }
 0x247   : > { %2131 = vmatpush.bf16.msk.msra.mxu2 %vm2130_vm5, %v2492_v53  ;;  %2155 = vmatpush.bf16.msk.msra.mxu3 %vm2698_vm9, %v2492_v53  ;;  %vm2132_vm0 = vmpackc.low %vm595_vm1, %vm591_vm10  ;;  %vm582_vm9 = vcmp.eq.s32.totalorder %v2625_v8, %v2756_v41  ;;  %vm619_vm10 = vcmp.eq.s32.totalorder %v2629_v9, %v2889_v4  ;;  %v1024_v31 = vor.u32 %v1023_v26, %v1020_v25 }
 0x248   : > { %vm2134_vm12 = vmpackc.low %vm587_vm14, %vm583_vm13  ;;  %vm3490_vm13 = vnez %v3455_v21  ;;  %v1281_v41 = vmul.f32 %v2946_v38, %v2943_v37 }
 0x24a   : > { %2101 = vmatpush.bf16.msk.msra.mxu0 %vm2100_vm6, %v2492_v53  ;;  %2125 = vmatpush.bf16.msk.msra.mxu1 %vm2640_vm4, %v2492_v53  ;;  %vm2102_vm4 = vmpackc.low %vm586_vm11, %vm582_vm9  ;;  %vm3489_vm6 = vnez %v3453_v20  ;;  %vm1036_vm9 = vsmask.f32 1280  ;;  %vm562_vm11 = vcmp.eq.s32.totalorder %v2625_v8, %v2620_v3  ;;  %v1007_v20 = vunpack.c.h.b16 %v997_v7 }
 0x24b   : > { %2133 = vmatpush.bf16.msk.msra.mxu2 %vm2132_vm0, %v2492_v53  ;;  %2157 = vmatpush.bf16.msk.msra.mxu3 %vm2647_vm8, %v2492_v53  ;;  %v2883_v0 = vpop.permute.xlu1 %453  ;;  %vm3488_vm8 = vnez %v3471_v33  ;;  %vm1035_vm0 = vcmask 1041408   ;;  %v2923_v27 = vpop.permute.xlu2 %450  ;;  %vm2108_vm14 = vmpackc.low %vm562_vm11, %vm558_vm15  ;;  %v1031_v33 = vrot.slane %v1029_v24, 7  ;;  %vm1040_vm15 = vcmask 1042432  }
 0x24c   : > { %v1009_v55 = vpack.c.b16 %v1007_v20, %v1007_v20  ;;  %1289 = vrot.lane.b32.xlu1 %v1281_v41, %s2493_s23  ;;  %vm604_vm11 = vcmp.eq.s32.totalorder %v2632_v12, %v2847_v61  ;;  %v3021_v7 = vstv %s2948_s22 }
 0x24d   : > { %v1032_v56 = vor.u32 %v1031_v33, %v1028_v32  ;;  %v1335_v11 = vmul.f32 %v3021_v7, %v2943_v37 }
 0x24e   : > { %2103 = vmatpush.bf16.msk.msra.mxu0 %vm2102_vm4, %v2492_v53  ;;  %vm559_vm4 = vcmp.eq.s32.totalorder %v2629_v9, %v2622_v6 }
 0x24f   : > { %2135 = vmatpush.bf16.msk.msra.mxu2 %vm2134_vm12, %v2492_v53  ;;  %vm563_vm12 = vcmp.eq.s32.totalorder %v2629_v9, %v2620_v3 }
 0x252   : > { %2105 = vmatpush.bf16.msk.msra.mxu0 %vm2717_vm7, %v2492_v53 }
 0x253   : > { %2137 = vmatpush.bf16.msk.msra.mxu2 %vm3488_vm8, %v2492_v53  ;;  %v2906_v15 = vpop.permute.xlu1 %501  ;;  %vm2936_vm8 = vmand %vm1035_vm0, %vm1036_vm9  ;;  %v3014_v2 = vpop.permute.xlu2 %498 }
 0x254   : > { %vm614_vm5 = vcmp.eq.s32.totalorder %v2625_v8, %v2906_v15  ;;  %vm615_vm2 = vcmp.eq.s32.totalorder %v2629_v9, %v2906_v15  ;;  %v1038_v54 = vsel %vm2936_vm8, %v1008_v30, %v1024_v31  ;;  %v1039_v1 = vsel %vm2936_vm8, %v1009_v55, %v1032_v56  ;;  %1343 = vrot.lane.b32.xlu1 %v1335_v11, %s2494_s7 }
 0x255   : > { %vm2126_vm7 = vmpackc.low %vm618_vm3, %vm614_vm5  ;;  %vm550_vm5 = vcmp.eq.s32.totalorder %v2625_v8, %v2883_v0  ;;  %v1043_v59 = vsel %vm1040_vm15, %v1038_v54, 1065369472  ;;  %vm601_vm8 = vcmp.eq.s32.totalorder %v2635_v13, %v2828_v57 }
 0x256   : > { %2107 = vmatpush.bf16.msk.msra.mxu0 %vm3489_vm6, %v2492_v53  ;;  %2127 = vmatpush.bf16.msk.msra.mxu1 %vm2126_vm7, %v2492_v53  ;;  %vm2158_vm1 = vmpackc.low %vm619_vm10, %vm615_vm2  ;;  %vm592_vm2 = vcmp.eq.s32.totalorder %v2632_v12, %v2790_v49  ;;  %vm554_vm7 = vcmp.eq.s32.totalorder %v2625_v8, %v2844_v60  ;;  %vm551_vm10 = vcmp.eq.s32.totalorder %v2629_v9, %v2883_v0  ;;  %vm1048_vm6 = vcmask 1043456  }
 0x257   : > { %2139 = vmatpush.bf16.msk.msra.mxu2 %vm3490_vm13, %v2492_v53  ;;  %2159 = vmatpush.bf16.msk.msra.mxu3 %vm2158_vm1, %v2492_v53  ;;  %vm2140_vm3 = vmpackc.low %vm563_vm12, %vm559_vm4  ;;  %vm1049_vm1 = vsmask.f32 3328  ;;  %vm555_vm13 = vcmp.eq.s32.totalorder %v2629_v9, %v2844_v60  ;;  %vm596_vm4 = vcmp.eq.s32.totalorder %v2632_v12, %v2758_v42 }
 0x258   : > { %vm2110_vm9 = vmpackc.low %vm554_vm7, %vm550_vm5  ;;  %vm600_vm7 = vcmp.eq.s32.totalorder %v2632_v12, %v2828_v57  ;;  %v1046_v57 = vsel %vm1040_vm15, %v1039_v1, 1065369472 }
 0x25a   : > { %2109 = vmatpush.bf16.msk.msra.mxu0 %vm2108_vm14, %v2492_v53  ;;  %vm2142_vm14 = vmpackc.low %vm555_vm13, %vm551_vm10  ;;  %vm605_vm13 = vcmp.eq.s32.totalorder %v2635_v13, %v2847_v61 }
 0x25b   : > { %2141 = vmatpush.bf16.msk.msra.mxu2 %vm2140_vm3, %v2492_v53  ;;  %v2958_v45 = vpop.permute.xlu1 %447  ;;  %vm2986_vm3 = vmpackc.low %vm596_vm4, %vm592_vm2  ;;  %vm546_vm2 = vcmp.eq.s32.totalorder %v2625_v8, %v2923_v27 }
 0x25c   : > { %vm542_vm12 = vcmp.eq.s32.totalorder %v2625_v8, %v2958_v45  ;;  %vm543_vm5 = vcmp.eq.s32.totalorder %v2629_v9, %v2958_v45  ;;  %vm2998_vm10 = vmand %vm1048_vm6, %vm1049_vm1  ;;  %vm547_vm1 = vcmp.eq.s32.totalorder %v2629_v9, %v2923_v27 }
 0x25d   : > { %vm2112_vm6 = vmpackc.low %vm546_vm2, %vm542_vm12  ;;  %v3031_v10 = vsel %vm2998_vm10, %v1043_v59, 0  ;;  %vm668_vm12 = vcmp.eq.s32.totalorder %v2632_v12, %v2801_v52  ;;  %vm610_vm2 = vcmp.eq.s32.totalorder %v2625_v8, %v3014_v2 }
 0x25e   : > { %2111 = vmatpush.bf16.msk.msra.mxu0 %vm2110_vm9, %v2492_v53  ;;  %vm3004_vm9 = vmpackc.low %vm604_vm11, %vm600_vm7  ;;  %vm593_vm11 = vcmp.eq.s32.totalorder %v2635_v13, %v2790_v49 }
 0x25f   : > { %2143 = vmatpush.bf16.msk.msra.mxu2 %vm2142_vm14, %v2492_v53  ;;  %vm2144_vm4 = vmpackc.low %vm547_vm1, %vm543_vm5  ;;  %vm597_vm5 = vcmp.eq.s32.totalorder %v2635_v13, %v2758_v42  ;;  %vm669_vm1 = vcmp.eq.s32.totalorder %v2635_v13, %v2801_v52  ;;  %v3098_v42 = vstv %s3012_s30 }
 0x260   : > { %vm2194_vm14 = vmpackc.low %vm605_vm13, %vm601_vm8  ;;  %v1308_v52 = vmul.f32 %v3098_v42, %v2943_v37 }
 0x261   : > { %vm3059_vm13 = vmpackc.low %vm597_vm5, %vm593_vm11  ;;  %vm664_vm11 = vcmp.eq.s32.totalorder %v2632_v12, %v2792_v50  ;;  %vm656_vm5 = vcmp.eq.s32.totalorder %v2632_v12, %v2799_v51 }
 0x262   : > { %2113 = vmatpush.bf16.msk.msra.mxu0 %vm2112_vm6, %v2492_v53  ;;  %vm611_vm6 = vcmp.eq.s32.totalorder %v2629_v9, %v3014_v2  ;;  %vm2178_vm8 = vmpackc.low %vm668_vm12, %vm664_vm11  ;;  %vm660_vm12 = vcmp.eq.s32.totalorder %v2632_v12, %v2776_v46  ;;  %1316 = vrot.lane.b32.xlu2 %v1308_v52, %s2495_s16  ;;  %vm3506_vm11 = vnez %v3487_v48 }
 0x263   : > { %2145 = vmatpush.bf16.msk.msra.mxu2 %vm2144_vm4, %v2492_v53  ;;  %v3036_v14 = vpop.permute.xlu1 %495 }
 0x264   : > { %vm606_vm7 = vcmp.eq.s32.totalorder %v2625_v8, %v3036_v14  ;;  %v3074_v8 = vsel %vm2998_vm10, %v1046_v57, 0 }
 0x265   : > { %vm2128_vm15 = vmpackc.low %vm610_vm2, %vm606_vm7  ;;  %1065 = vmatmul.bf16.vlgmr.msra.gmra.mxu0 %v3031_v10  ;;  %vm3501_vm7 = vnez %v3481_v43 }
 0x266   : > { %2163 = vmatpush.bf16.msk.msrb.mxu0 %vm3004_vm9, %v2492_v53  ;;  %vm607_vm9 = vcmp.eq.s32.totalorder %v2629_v9, %v3036_v14  ;;  %2129 = vmatpush.bf16.msk.msra.mxu1 %vm2128_vm15, %v2492_v53  ;;  %v3095_v9 = vld [vmem:[%s3434_s3 + $0x10] sm:$0xff]  ;;  %vm2180_vm2 = vmpackc.low %vm660_vm12, %vm656_vm5  ;;  %vm3509_vm5 = vnez %v3459_v23  ;;  %vm3510_vm12 = vnez %v3479_v40 }
 0x267   : > { %2195 = vmatpush.bf16.msk.msrb.mxu2 %vm2194_vm14, %v2492_v53  ;;  %vm2160_vm4 = vmpackc.low %vm611_vm6, %vm607_vm9  ;;  %vm665_vm14 = vcmp.eq.s32.totalorder %v2635_v13, %v2792_v50  ;;  %v1283_v49 = vmul.f32 %v2946_v38, %v3095_v9  ;;  %v3109_v50 = vld [vmem:[%s3434_s3 + $0x8] sm:$0xff]  ;;  %vm661_vm9 = vcmp.eq.s32.totalorder %v2635_v13, %v2776_v46  ;;  %vm3503_vm6 = vnez %v3473_v35 }
 0x268   : > { %1091 = vmatmul.bf16.vlgmr.msra.gmra.mxu2 %v3031_v10  ;;  %2161 = vmatpush.bf16.msk.msra.mxu3 %vm2160_vm4, %v2492_v53  ;;  %vm2210_vm10 = vmpackc.low %vm669_vm1, %vm665_vm14  ;;  %v1282_v18 = vmul.f32 %v2946_v38, %v3109_v50  ;;  %v1309_v43 = vmul.f32 %v3098_v42, %v3109_v50  ;;  %vm3504_vm1 = vnez %v3485_v47  ;;  %vm3505_vm4 = vnez %v3475_v36 }
 0x269   : > { %1078 = vmatmul.bf16.vlgmr.msra.gmra.mxu1 %v3074_v8  ;;  %1293 = vrot.lane.b32.xlu1 %v1283_v49, %s2493_s23  ;;  %vm560_vm14 = vcmp.eq.s32.totalorder %v2632_v12, %v2622_v6  ;;  %v3165_v35 = vstv %s1360_s14 }
 0x26a   : > { %2165 = vmatpush.bf16.msk.msrb.mxu0 %vm2986_vm3, %v2492_v53  ;;  %2179 = vmatpush.bf16.msk.msrb.mxu1 %vm2178_vm8, %v2492_v53  ;;  %vm657_vm3 = vcmp.eq.s32.totalorder %v2635_v13, %v2799_v51  ;;  %vm3507_vm8 = vnez %v3457_v22  ;;  %v3178_v22 = vld [vmem:[%s3434_s3 + $0x18] sm:$0xff]  ;;  %v1364_v23 = vmul.f32 %v3165_v35, %v3095_v9 }
 0x26b   : > { %2197 = vmatpush.bf16.msk.msrb.mxu2 %vm3059_vm13, %v2492_v53  ;;  %1104 = vmatmul.bf16.vlgmr.msra.gmra.mxu3 %v3074_v8  ;;  %vm3502_vm13 = vnez %v3483_v44  ;;  %vm2212_vm15 = vmpackc.low %vm661_vm9, %vm657_vm3  ;;  %v1336_v44 = vmul.f32 %v3021_v7, %v3109_v50  ;;  %vm561_vm3 = vcmp.eq.s32.totalorder %v2635_v13, %v2622_v6  ;;  %vm565_vm9 = vcmp.eq.s32.totalorder %v2635_v13, %v2620_v3 }
 0x26c   : > { %2211 = vmatpush.bf16.msk.msrb.mxu3 %vm2210_vm10, %v2492_v53  ;;  %1291 = vrot.lane.b32.xlu0 %v1282_v18, %s2493_s23  ;;  %vm3508_vm10 = vnez %v3477_v39  ;;  %v1362_v6 = vmul.f32 %v3165_v35, %v2943_v37 }
 0x26d   : > { %1318 = vrot.lane.b32.xlu2 %v1309_v43, %s2495_s16 }
 0x26e   : > { %2167 = vmatpush.bf16.msk.msrb.mxu0 %vm3501_vm7, %v2492_v53  ;;  %2181 = vmatpush.bf16.msk.msrb.mxu1 %vm2180_vm2, %v2492_v53  ;;  %vm564_vm7 = vcmp.eq.s32.totalorder %v2632_v12, %v2620_v3  ;;  %v1284_v3 = vmul.f32 %v2946_v38, %v3178_v22 }
 0x26f   : > { %2199 = vmatpush.bf16.msk.msrb.mxu2 %vm3502_vm13, %v2492_v53  ;;  %vm2172_vm2 = vmpackc.low %vm564_vm7, %vm560_vm14  ;;  %vm557_vm14 = vcmp.eq.s32.totalorder %v2635_v13, %v2844_v60  ;;  %vm620_vm7 = vcmp.eq.s32.totalorder %v2632_v12, %v2889_v4 }
 0x270   : > { %2213 = vmatpush.bf16.msk.msrb.mxu3 %vm2212_vm15, %v2492_v53  ;;  %vm2204_vm13 = vmpackc.low %vm565_vm9, %vm561_vm3  ;;  %vm552_vm15 = vcmp.eq.s32.totalorder %v2632_v12, %v2883_v0  ;;  %vm544_vm3 = vcmp.eq.s32.totalorder %v2632_v12, %v2958_v45  ;;  %vm3514_vm9 = vnez %v3451_v17  ;;  %v1337_v17 = vmul.f32 %v3021_v7, %v3095_v9 }
 0x271   : > { %1345 = vrot.lane.b32.xlu1 %v1336_v44, %s2494_s7 }
 0x272   : > { %2169 = vmatpush.bf16.msk.msrb.mxu0 %vm3503_vm6, %v2492_v53  ;;  %2183 = vmatpush.bf16.msk.msrb.mxu1 %vm3504_vm1, %v2492_v53  ;;  %vm3511_vm6 = vnez %v3465_v28  ;;  %vm553_vm1 = vcmp.eq.s32.totalorder %v2635_v13, %v2883_v0  ;;  %v1365_v28 = vmul.f32 %v3165_v35, %v3178_v22 }
 0x273   : > { %2201 = vmatpush.bf16.msk.msrb.mxu2 %vm3505_vm4, %v2492_v53  ;;  %vm3512_vm4 = vnez %v3467_v29  ;;  %v1338_v29 = vmul.f32 %v3021_v7, %v3178_v22 }
 0x274   : > { %2215 = vmatpush.bf16.msk.msrb.mxu3 %vm3506_vm11, %v2492_v53  ;;  %vm556_vm11 = vcmp.eq.s32.totalorder %v2632_v12, %v2844_v60 }
 0x275   : > { %1370 = vrot.lane.b32.xlu2 %v1362_v6, %s2496_s20 }
 0x276   : > { %2171 = vmatpush.bf16.msk.msrb.mxu0 %vm3507_vm8, %v2492_v53  ;;  %2185 = vmatpush.bf16.msk.msrb.mxu1 %vm3508_vm10, %v2492_v53  ;;  %vm2174_vm8 = vmpackc.low %vm556_vm11, %vm552_vm15  ;;  %vm616_vm10 = vcmp.eq.s32.totalorder %v2632_v12, %v2906_v15 }
 0x277   : > { %2203 = vmatpush.bf16.msk.msrb.mxu2 %vm3509_vm5, %v2492_v53  ;;  %vm2206_vm5 = vmpackc.low %vm557_vm14, %vm553_vm1 }
 0x278   : > { %2217 = vmatpush.bf16.msk.msrb.mxu3 %vm3510_vm12, %v2492_v53  ;;  %vm3513_vm12 = vnez %v3449_v16  ;;  %vm2190_vm15 = vmpackc.low %vm620_vm7, %vm616_vm10  ;;  %v1310_v16 = vmul.f32 %v3098_v42, %v3095_v9  ;;  %vm608_vm10 = vcmp.eq.s32.totalorder %v2632_v12, %v3036_v14  ;;  %vm613_vm7 = vcmp.eq.s32.totalorder %v2635_v13, %v3014_v2 }
 0x279   : > { %1295 = vrot.lane.b32.xlu1 %v1284_v3, %s2493_s23  ;;  %s3285_s23 = scalar_lea.vmem %s3435_s4, %s2261_s21  ;;  %s1797_s21 = sshll.u32 %s1793_s18, 4  ;;  %s1798_s21 = int_to_ptr.hbm [resolvable:$true] %s1797_s21 }
 0x27a   : > { %2173 = vmatpush.bf16.msk.msrb.mxu0 %vm2172_vm2, %v2492_v53  ;;  %2187 = vmatpush.bf16.msk.msrb.mxu1 %vm3511_vm6, %v2492_v53  ;;  %vm545_vm2 = vcmp.eq.s32.totalorder %v2635_v13, %v2958_v45  ;;  %vm617_vm6 = vcmp.eq.s32.totalorder %v2635_v13, %v2906_v15  ;;  %s2390_s22 = sshra.s32 %s1798_s21, 4  ;;  %s2391_s22 = int_to_ptr.hbm [resolvable:$true] %s2390_s22 }
 0x27b   : > { %2205 = vmatpush.bf16.msk.msrb.mxu2 %vm2204_vm13, %v2492_v53  ;;  %vm548_vm13 = vcmp.eq.s32.totalorder %v2632_v12, %v2923_v27  ;;  %p2397_p1 = scmp.lt.s32.totalorder %s2391_s22, %s3436_s5 }
 0x27c   : > { %2219 = vmatpush.bf16.msk.msrb.mxu3 %vm3512_vm4, %v2492_v53  ;;  %vm2176_vm1 = vmpackc.low %vm548_vm13, %vm544_vm3  ;;  %vm549_vm4 = vcmp.eq.s32.totalorder %v2635_v13, %v2923_v27  ;;  %vm612_vm3 = vcmp.eq.s32.totalorder %v2632_v12, %v3014_v2  ;;  %v1363_v12 = vmul.f32 %v3165_v35, %v3109_v50 }
 0x27d   : > { %vm2208_vm11 = vmpackc.low %vm549_vm4, %vm545_vm2  ;;  %1320 = vrot.lane.b32.xlu2 %v1310_v16, %s2495_s16  ;;  %v2497_v16 = vmov 12  }
 0x27e   : > { %2175 = vmatpush.bf16.msk.msrb.mxu0 %vm2174_vm8, %v2492_v53  ;;  %2189 = vmatpush.bf16.msk.msrb.mxu1 %vm3513_vm12, %v2492_v53  ;;  %vm621_vm8 = vcmp.eq.s32.totalorder %v2635_v13, %v2889_v4  ;;  %vm2192_vm12 = vmpackc.low %vm612_vm3, %vm608_vm10 }
 0x27f   : > { %2207 = vmatpush.bf16.msk.msrb.mxu2 %vm2206_vm5, %v2492_v53  ;;  %vm2222_vm14 = vmpackc.low %vm621_vm8, %vm617_vm6  ;;  %vm609_vm5 = vcmp.eq.s32.totalorder %v2635_v13, %v3036_v14  ;;  %v1311_v13 = vmul.f32 %v3098_v42, %v3178_v22  ;;  %vm1260_vm8 = vcmask 1045504   ;;  %2341 = vset.pattern.permute.xlu1 %v2497_v16 }
 0x280   : > { %2221 = vmatpush.bf16.msk.msrb.mxu3 %vm3514_vm9, %v2492_v53  ;;  %vm2224_vm2 = vmpackc.low %vm613_vm7, %vm609_vm5  ;;  %vm1406_vm5 = vcmask 64512   ;;  %2340 = vset.pattern.permute.xlu2 %v2497_v16 }
 0x281   : > { %1347 = vrot.lane.b32.xlu1 %v1337_v17, %s2494_s7  ;;  %v2498_v17 = vmov 0.0  }
 0x282   : > { %2177 = vmatpush.bf16.msk.msrb.mxu0 %vm2176_vm1, %v2492_v53  ;;  %2191 = vmatpush.bf16.msk.msrb.mxu1 %vm2190_vm15, %v2492_v53 }
 0x283   : > { %2209 = vmatpush.bf16.msk.msrb.mxu2 %vm2208_vm11, %v2492_v53 }
 0x284   : > { %2223 = vmatpush.bf16.msk.msrb.mxu3 %vm2222_vm14, %v2492_v53  ;;  %vm1265_vm14 = vcmask 1046528  }
 0x285   : > { %1117 = vmatmul.bf16.vlgmr.msrb.gmra.mxu0 %v3031_v10  ;;  %1372 = vrot.lane.b32.xlu2 %v1363_v12, %s2496_s20 }
 0x286   : > { %1143 = vmatmul.bf16.vlgmr.msrb.gmra.mxu2 %v3031_v10  ;;  %2193 = vmatpush.bf16.msk.msrb.mxu1 %vm2192_vm12, %v2492_v53 }
 0x288   : > { %2225 = vmatpush.bf16.msk.msrb.mxu3 %vm2224_vm2, %v2492_v53 }
 0x289   : > { %1130 = vmatmul.bf16.vlgmr.msrb.gmra.mxu1 %v3074_v8  ;;  %1374 = vrot.lane.b32.xlu1 %v1364_v23, %s2496_s20 }
 0x28b   : > { %1156 = vmatmul.bf16.vlgmr.msrb.gmra.mxu3 %v3074_v8 }
 0x28d   : > { %1322 = vrot.lane.b32.xlu2 %v1311_v13, %s2495_s16 }
 0x291   : > { %1376 = vrot.lane.b32.xlu1 %v1365_v28, %s2496_s20  ;;  %s1795_s20 = sshll.u32 %s286_s19, 4  ;;  %s1796_s20 = int_to_ptr.vmem [resolvable:$true] %s1795_s20 }
 0x295   : > { %1349 = vrot.lane.b32.xlu2 %v1338_v29, %s2494_s7  ;;  %s2396_s7 = scalar_lea.hbm %s3436_s5, 8 }
 0x2bc   : > { %v1317_v39 = vpop.permute.xlu2 %1316 }
 0x2be   : > { %v1290_v36 = vpop.permute.xlu1 %1289 }
 0x2bf   : > { %v1301_v25 = vadd.f32 %v1290_v36, %v2943_v37 }
 0x2c1   : > { %v1328_v38 = vadd.f32 %v1317_v39, %v1301_v25 }
 0x2c6   : > { %v1344_v40 = vpop.permute.xlu1 %1343 }
 0x2c7   : > { %v1319_v46 = vpop.permute.xlu2 %1318  ;;  %v1355_v58 = vadd.f32 %v1344_v40, %v1328_v38 }
 0x2cf   : > { %v1371_v60 = vpop.permute.xlu2 %1370 }
 0x2d0   : > { %v1382_v57 = vadd.f32 %v1371_v60, %v1355_v58 }
 0x2d2   : > { %1388 = vperm.xlu2 %2340, %v1382_v57  }
 0x2d7   : > { %v1321_v20 = vpop.permute.xlu2 %1320 }
 0x2db   : > { %v1294_v47 = vpop.permute.xlu1 %1293 }
 0x2dc   : > { %v1303_v7 = vadd.f32 %v1294_v47, %v3095_v9 }
 0x2de   : > { %v1292_v49 = vpop.permute.xlu0 %1291  ;;  %v1330_v28 = vadd.f32 %v1321_v20, %v1303_v7 }
 0x2df   : > { %v1373_v62 = vpop.permute.xlu2 %1372  ;;  %v1302_v18 = vadd.f32 %v1292_v49, %v3109_v50 }
 0x2e1   : > { %v1329_v3 = vadd.f32 %v1319_v46, %v1302_v18 }
 0x2e2   : > { %v1066_v48 = vpop.f32.mrf.mxu0 }
 0x2e3   : > { %v3265_v15 = vpop.permute.xlu1 %1345 }
 0x2e4   : > { %v1356_v39 = vadd.f32 %v3265_v15, %v1329_v3 }
 0x2e6   : > { %v1079_v51 = vpop.f32.mrf.mxu1 }
 0x2e7   : > { %v1080_v53 = vadd.f32 %v1079_v51, %v1066_v48  ;;  %v1323_v29 = vpop.permute.xlu2 %1322  ;;  %v1383_v51 = vadd.f32 %v1373_v62, %v1356_v39 }
 0x2e9   : > { %v1176_v0 = vmax.f32 %v1080_v53, 1.0  ;;  %vm1248_vm11 = vcmp.gt.f32.partialorder %v1080_v53, 0.0  ;;  %1393 = vperm.xlu1 %2341, %v1383_v51  }
 0x2ea   : > { %v1068_v19 = vpop.f32.mrf.mxu0  ;;  %v2226_v12 = vsel %vm1248_vm11, 1.0, %v2498_v17 }
 0x2eb   : > { %v1092_v4 = vpop.f32.mrf.mxu2  ;;  %2354 = vrcp.f32 %v1176_v0  ;;  %v3271_v33 = vpop.permute.xlu1 %1295  ;;  %v1191_v41 = vand.u32 2147483648, %v1176_v0  ;;  %vm1185_vm9 = vweird.f32 %v1176_v0  ;;  %v1189_v54 = vand.u32 2147483647, %v1176_v0 }
 0x2ec   : > { %v1304_v60 = vadd.f32 %v3271_v33, %v3178_v22 }
 0x2ed   : > { %v1192_v59 = vor.u32 1.1754944e-38, %v1191_v41  ;;  %vm1190_vm6 = vcmp.eq.f32.partialorder %v1189_v54, 8.507059e+37 }
 0x2ee   : > { %v1105_v24 = vpop.f32.mrf.mxu3  ;;  %v1081_v27 = vpop.f32.mrf.mxu1 }
 0x2ef   : > { %v3268_v26 = vadd.f32 %v1105_v24, %v1092_v4  ;;  %v1331_v24 = vadd.f32 %v1323_v29, %v1304_v60 }
 0x2f1   : > { %v1177_v30 = vmax.f32 %v3268_v26, 1.0  ;;  %v2355_v31 = vpop.eup %2354  ;;  %vm1249_vm12 = vcmp.gt.f32.partialorder %v3268_v26, 0.0 }
 0x2f2   : > { %v1181_v21 = vmul.f32 %v2355_v31, %v1176_v0  ;;  %vm1186_vm13 = vweird.f32 %v2355_v31  ;;  %v2227_v27 = vsel %vm1249_vm12, 1.0, %v2498_v17  ;;  %vm1658_vm12 = vcmp.lt.s32.totalorder %v441_v5, 512 }
 0x2f3   : > { %v1094_v32 = vpop.f32.mrf.mxu2  ;;  %2356 = vrcp.f32 %v1177_v30  ;;  %vm1187_vm15 = vmor %vm1185_vm9, %vm1186_vm13  ;;  %v1348_v10 = vpop.permute.xlu1 %1347  ;;  %vm1200_vm1 = vweird.f32 %v1177_v30  ;;  %v1206_v14 = vand.u32 2147483648, %v1177_v30  ;;  %v1204_v42 = vand.u32 2147483647, %v1177_v30 }
 0x2f4   : > { %v1182_v45 = vsub.f32 1.0, %v1181_v21  ;;  %v1357_v0 = vadd.f32 %v1348_v10, %v1330_v28  ;;  %v1350_v21 = vpop.permute.xlu2 %1349 }
 0x2f5   : > { %v1207_v6 = vor.u32 1.1754944e-38, %v1206_v14  ;;  %vm1205_vm3 = vcmp.eq.f32.partialorder %v1204_v42, 8.507059e+37  ;;  %v1358_v38 = vadd.f32 %v1350_v21, %v1331_v24 }
 0x2f6   : > { %v1107_v55 = vpop.f32.mrf.mxu3  ;;  %v1183_v56 = vmul.f32 %v2355_v31, %v1182_v45 }
 0x2f8   : > { %v1184_v1 = vadd.f32 %v2355_v31, %v1183_v56 }
 0x2f9   : > { %v2357_v63 = vpop.eup %2356 }
 0x2fa   : > { %v1196_v2 = vmul.f32 %v2357_v63, %v1177_v30  ;;  %v1188_v11 = vsel %vm1187_vm15, %v2355_v31, %v1184_v1  ;;  %vm1201_vm4 = vweird.f32 %v2357_v63 }
 0x2fb   : > { %v1193_v61 = vsel %vm1190_vm6, %v1192_v59, %v1188_v11  ;;  %vm3277_vm10 = vmor %vm1200_vm1, %vm1201_vm4  ;;  %v1375_v47 = vpop.permute.xlu1 %1374 }
 0x2fc   : > { %v1197_v8 = vsub.f32 1.0, %v1196_v2  ;;  %v1240_v52 = vperm.slane %v1193_v61, 6  ;;  %v1384_v25 = vadd.f32 %v1375_v47, %v1357_v0 }
 0x2fe   : > { %v1198_v43 = vmul.f32 %v2357_v63, %v1197_v8  ;;  %v1244_v44 = vmul.f32 %v1240_v52, %v1080_v53  ;;  %1398 = vperm.xlu2 %2340, %v1384_v25  }
 0x300   : > { %v1199_v23 = vadd.f32 %v2357_v63, %v1198_v43  ;;  %v1261_v36 = vsel %vm1260_vm8, %v1244_v44, %v2226_v12 }
 0x301   : > { %v1266_v46 = vsel %vm1265_vm14, %v1261_v36, 0.0  ;;  %2230 = vmatpush.msk.msra.mxu0 %vm1265_vm14, %v1261_v36 }
 0x302   : > { %v1118_v13 = vpop.f32.mrf.mxu0  ;;  %v1203_v40 = vsel %vm3277_vm10, %v2357_v63, %v1199_v23  ;;  %1270 = vst [vmem:[%s3285_s23] sm:$0x7f] %v1266_v46  ;;  %2231 = vmatmul.msk.f32.vlgmr.msra.gmra.mxu0 %vm1406_vm5, %v2943_v37 }
 0x303   : > { %v1208_v48 = vsel %vm1205_vm3, %v1207_v6, %v1203_v40  ;;  %vm1651_vm3 = vcmask 1042434  }
 0x304   : > { %v1241_v53 = vperm.slane %v1208_v48, 6 }
 0x306   : > { %v1131_v4 = vpop.f32.mrf.mxu1  ;;  %v1245_v15 = vmul.f32 %v1241_v53, %v3268_v26  ;;  %v1377_v26 = vpop.permute.xlu1 %1376  ;;  %2352 = vset.pattern.permute.xlu2 %v2491_v34 }
 0x307   : > { %v1132_v19 = vadd.f32 %v1131_v4, %v1118_v13  ;;  %v1385_v41 = vadd.f32 %v1377_v26, %v1358_v38 }
 0x308   : > { %v1262_v32 = vsel %vm1260_vm8, %v1245_v15, %v2227_v27 }
 0x309   : > { %v1144_v20 = vpop.f32.mrf.mxu2  ;;  %v1178_v30 = vmax.f32 %v1132_v19, 1.0  ;;  %v1267_v33 = vsel %vm1265_vm14, %v1262_v32, 0.0  ;;  %2235 = vmatpush.msk.msra.mxu1 %vm1265_vm14, %v1262_v32  ;;  %1403 = vperm.xlu1 %2341, %v1385_v41   ;;  %vm1250_vm15 = vcmp.gt.f32.partialorder %v1132_v19, 0.0 }
 0x30a   : > { %v1120_v31 = vpop.f32.mrf.mxu0  ;;  %1271 = vst [vmem:[%s3285_s23 + $0x8] sm:$0x7f] %v1267_v33  ;;  %2236 = vmatmul.msk.f32.vlgmr.msra.gmra.mxu1 %vm1406_vm5, %v2943_v37  ;;  %2232 = vmatmul.msk.f32.gmra.mxu0 %vm1406_vm5, %v3109_v50  ;;  %v2228_v35 = vsel %vm1250_vm15, 1.0, %v2498_v17 }
 0x30b   : > { %2358 = vrcp.f32 %v1178_v30  ;;  %v1221_v1 = vand.u32 2147483648, %v1178_v30  ;;  %v1219_v10 = vand.u32 2147483647, %v1178_v30  ;;  %vm1215_vm2 = vweird.f32 %v1178_v30 }
 0x30d   : > { %v1222_v57 = vor.u32 1.1754944e-38, %v1221_v1  ;;  %vm1220_vm13 = vcmp.eq.f32.partialorder %v1219_v10, 8.507059e+37 }
 0x30e   : > { %v1157_v45 = vpop.f32.mrf.mxu3  ;;  %v1133_v55 = vpop.f32.mrf.mxu1 }
 0x30f   : > { %v1158_v54 = vadd.f32 %v1157_v45, %v1144_v20 }
 0x311   : > { %v1179_v56 = vmax.f32 %v1158_v54, 1.0  ;;  %v1146_v58 = vpop.f32.mrf.mxu2  ;;  %v2359_v59 = vpop.eup %2358  ;;  %vm1251_vm10 = vcmp.gt.f32.partialorder %v1158_v54, 0.0 }
 0x312   : > { %v1211_v62 = vmul.f32 %v2359_v59, %v1178_v30  ;;  %2237 = vmatmul.msk.f32.gmra.mxu1 %vm1406_vm5, %v3109_v50  ;;  %2233 = vmatmul.msk.f32.gmra.mxu0 %vm1406_vm5, %v3095_v9  ;;  %vm1216_vm7 = vweird.f32 %v2359_v59  ;;  %v2229_v36 = vsel %vm1251_vm10, 1.0, %v2498_v17  ;;  %v2342_v17 = vpack.i.bf16 %v3095_v9, %v3178_v22 }
 0x313   : > { %2360 = vrcp.f32 %v1179_v56  ;;  %vm1217_vm9 = vmor %vm1215_vm2, %vm1216_vm7  ;;  %v1236_v52 = vand.u32 2147483648, %v1179_v56  ;;  %v1234_v43 = vand.u32 2147483647, %v1179_v56  ;;  %vm1230_vm1 = vweird.f32 %v1179_v56 }
 0x314   : > { %v1212_v63 = vsub.f32 1.0, %v1211_v62  ;;  %2343 = vrot.lane.b32.xlu1 %v2342_v17, %s2499_s24 }
 0x315   : > { %v1237_v3 = vor.u32 1.1754944e-38, %v1236_v52  ;;  %vm1235_vm11 = vcmp.eq.f32.partialorder %v1234_v43, 8.507059e+37 }
 0x316   : > { %v1159_v2 = vpop.f32.mrf.mxu3  ;;  %v1213_v7 = vmul.f32 %v2359_v59, %v1212_v63 }
 0x318   : > { %v1214_v14 = vadd.f32 %v2359_v59, %v1213_v7 }
 0x319   : > { %v2361_v11 = vpop.eup %2360 }
 0x31a   : > { %v1226_v34 = vmul.f32 %v2361_v11, %v1179_v56  ;;  %v1218_v61 = vsel %vm1217_vm9, %v2359_v59, %v1214_v14  ;;  %2238 = vmatmul.msk.f32.gmra.mxu1 %vm1406_vm5, %v3095_v9  ;;  %2234 = vmatmul.msk.f32.gmra.mxu0 %vm1406_vm5, %v3178_v22  ;;  %vm1231_vm6 = vweird.f32 %v2361_v11 }
 0x31b   : > { %v1223_v8 = vsel %vm1220_vm13, %v1222_v57, %v1218_v61  ;;  %vm1232_vm4 = vmor %vm1230_vm1, %vm1231_vm6 }
 0x31c   : > { %v1227_v42 = vsub.f32 1.0, %v1226_v34  ;;  %v1242_v49 = vperm.slane %v1223_v8, 6 }
 0x31e   : > { %v1228_v18 = vmul.f32 %v2361_v11, %v1227_v42  ;;  %v1246_v44 = vmul.f32 %v1242_v49, %v1132_v19 }
 0x320   : > { %v1229_v6 = vadd.f32 %v2361_v11, %v1228_v18  ;;  %v1263_v16 = vsel %vm1260_vm8, %v1246_v44, %v2228_v35 }
 0x321   : > { %v1268_v23 = vsel %vm1265_vm14, %v1263_v16, 0.0  ;;  %2240 = vmatpush.msk.msra.mxu2 %vm1265_vm14, %v1263_v16 }
 0x322   : > { %v1233_v12 = vsel %vm1232_vm4, %v2361_v11, %v1229_v6  ;;  %1272 = vst [vmem:[%s3285_s23 + $0x10] sm:$0x7f] %v1268_v23  ;;  %2241 = vmatmul.msk.f32.vlgmr.msra.gmra.mxu2 %vm1406_vm5, %v2943_v37  ;;  %2239 = vmatmul.msk.f32.gmra.mxu1 %vm1406_vm5, %v3178_v22 }
 0x323   : > { %v1238_v13 = vsel %vm1235_vm11, %v1237_v3, %v1233_v12 }
 0x324   : > { %v1243_v28 = vperm.slane %v1238_v13, 6 }
 0x326   : > { %v1247_v29 = vmul.f32 %v1243_v28, %v1158_v54 }
 0x328   : > { %v1264_v39 = vsel %vm1260_vm8, %v1247_v29, %v2229_v36 }
 0x329   : > { %v1269_v40 = vsel %vm1265_vm14, %v1264_v39, 0.0  ;;  %2245 = vmatpush.msk.msra.mxu3 %vm1265_vm14, %v1264_v39  ;;  %vm1558_vm14 = vcmask 261120  }
 0x32a   : > { %1273 = vst [vmem:[%s3285_s23 + $0x18] sm:$0x7f] %v1269_v40  ;;  %2246 = vmatmul.msk.f32.vlgmr.msra.gmra.mxu3 %vm1406_vm5, %v2943_v37  ;;  %2242 = vmatmul.msk.f32.gmra.mxu2 %vm1406_vm5, %v3109_v50  ;;  %s2392_s23 = scalar_lea.hbm %s2391_s22, 4 }
 0x32b   : > { %p2393_p12 = scmp.ne.s32.totalorder %s2391_s22, %s2392_s23  ;;  %p2398_p2 = scmp.lt.s32.totalorder %s2396_s7, %s2392_s23 }
 0x32c   : > { %v1389_v60 = vpop.permute.xlu2 %1388 }
 0x32d   : > { %p2394_p13 = pnand %p2393_p12, %p2579_p4  ;;  %p2399_p3 = por %p2398_p2, %p2397_p1 }
 0x32f   : > { %p2395_p0 = pneg %p2394_p13 }
 0x331   : > { %p2400_p5 = pnand %p2399_p3, %p2395_p0 }
 0x332   : > { %2247 = vmatmul.msk.f32.gmra.mxu3 %vm1406_vm5, %v3109_v50  ;;  %2243 = vmatmul.msk.f32.gmra.mxu2 %vm1406_vm5, %v3095_v9 }
 0x33a   : > { %2248 = vmatmul.msk.f32.gmra.mxu3 %vm1406_vm5, %v3095_v9  ;;  %2244 = vmatmul.msk.f32.gmra.mxu2 %vm1406_vm5, %v3178_v22 }
 0x342   : > { %2249 = vmatmul.msk.f32.gmra.mxu3 %vm1406_vm5, %v3178_v22  ;;  %vm1649_vm5 = vcmask 1040384  }
 0x358   : > { %v1399_v19 = vpop.permute.xlu2 %1398 }
 0x35b   : > { %v1394_v51 = vpop.permute.xlu1 %1393 }
 0x37b   : > { %v3349_v4 = vpop.permute.xlu1 %1403 }
 0x37f   : > { %v1436_v46 = vpop.f32.mrf.mxu0 }
 0x380   : > { %v1437_v22 = vadd.f32 %v1436_v46, %v1389_v60 }
 0x382   : > { %v1535_v38 = vmax.f32 %v1437_v22, 0.0 }
 0x387   : > { %v1465_v47 = vpop.f32.mrf.mxu1  ;;  %v1439_v48 = vpop.f32.mrf.mxu0 }
 0x388   : > { %v1440_v9 = vadd.f32 %v1439_v48, %v1394_v51  ;;  %v1466_v45 = vadd.f32 %v1465_v47, %v1389_v60 }
 0x38a   : > { %v1539_v32 = vmax.f32 %v1440_v9, 0.0  ;;  %v1536_v59 = vmax.f32 %v1466_v45, 0.0  ;;  %v1552_v45 = vld [vmem:[%s3434_s3 + $0x21] sm:$0x1] }
 0x38c   : > { %v1661_v1 = vadd.f32 %v1536_v59, %v1535_v38 }
 0x38f   : > { %v1468_v53 = vpop.f32.mrf.mxu1  ;;  %v1442_v0 = vpop.f32.mrf.mxu0 }
 0x390   : > { %v1443_v25 = vadd.f32 %v1442_v0, %v1399_v19  ;;  %v1469_v41 = vadd.f32 %v1468_v53, %v1394_v51  ;;  %v2500_v0 = vmov 512.0  }
 0x391   : > { %2362 = vrcp.f32 %v2500_v0 }
 0x392   : > { %v1543_v30 = vmax.f32 %v1443_v25, 0.0  ;;  %v1540_v58 = vmax.f32 %v1469_v41, 0.0 }
 0x394   : > { %v1666_v8 = vadd.f32 %v1540_v58, %v1539_v32 }
 0x397   : > { %v1471_v15 = vpop.f32.mrf.mxu1  ;;  %v1445_v24 = vpop.f32.mrf.mxu0 }
 0x398   : > { %v1446_v27 = vadd.f32 %v1445_v24, %v3349_v4  ;;  %v1472_v21 = vadd.f32 %v1471_v15, %v1399_v19  ;;  %v2363_v15 = vpop.eup %2362 }
 0x399   : > { %vm1686_vm8 = vweird.f32 %v2363_v15 }
 0x39a   : > { %v1547_v20 = vmax.f32 %v1446_v27, 0.0  ;;  %v1544_v54 = vmax.f32 %v1472_v21, 0.0  ;;  %v2347_v27 = vpack.i.bf16 %v2943_v37, %v3109_v50 }
 0x39c   : > { %1574 = vmatpush.msrb.mxu0 %v1547_v20  ;;  %v1671_v3 = vadd.f32 %v1544_v54, %v1543_v30 }
 0x39e   : > { %1575 = vmatpush.msrb.mxu0 %v1543_v30 }
 0x39f   : > { %v1474_v31 = vpop.f32.mrf.mxu1 }
 0x3a0   : > { %v1475_v33 = vadd.f32 %v1474_v31, %v3349_v4  ;;  %1576 = vmatpush.msrb.mxu0 %v1539_v32 }
 0x3a2   : > { %v1548_v26 = vmax.f32 %v1475_v33, 0.0  ;;  %1577 = vmatpush.msrb.mxu0 %v1535_v38 }
 0x3a4   : > { %1594 = vmatpush.msrb.mxu1 %v1548_v26  ;;  %v1676_v40 = vadd.f32 %v1548_v26, %v1547_v20  ;;  %v1551_v20 = vld [vmem:[%s3434_s3 + $0x20] sm:$0x1] }
 0x3a5   : > { %v1494_v55 = vpop.f32.mrf.mxu2  ;;  %2250 = vmatmul.msk.f32.vlgmr.msrb.gmra.mxu0 %vm1558_vm14, %v1551_v20 }
 0x3a6   : > { %v1495_v56 = vadd.f32 %v1494_v55, %v1389_v60  ;;  %1595 = vmatpush.msrb.mxu1 %v1544_v54 }
 0x3a8   : > { %1596 = vmatpush.msrb.mxu1 %v1540_v58  ;;  %v1537_v62 = vmax.f32 %v1495_v56, 0.0 }
 0x3aa   : > { %1597 = vmatpush.msrb.mxu1 %v1536_v59  ;;  %v1662_v10 = vadd.f32 %v1661_v1, %v1537_v62 }
 0x3ab   : > { %2251 = vmatmul.msk.f32.vlgmr.msrb.gmra.mxu1 %vm1558_vm14, %v1551_v20 }
 0x3ad   : > { %v1523_v63 = vpop.f32.mrf.mxu3  ;;  %v1497_v7 = vpop.f32.mrf.mxu2 }
 0x3ae   : > { %v1524_v2 = vadd.f32 %v1523_v63, %v1389_v60  ;;  %v1498_v14 = vadd.f32 %v1497_v7, %v1394_v51 }
 0x3b0   : > { %v1538_v11 = vmax.f32 %v1524_v2, 0.0  ;;  %v1541_v34 = vmax.f32 %v1498_v14, 0.0 }
 0x3b2   : > { %v1663_v57 = vadd.f32 %v1662_v10, %v1538_v11  ;;  %v1667_v52 = vadd.f32 %v1666_v8, %v1541_v34 }
 0x3b4   : > { %1664 = vadd.xlane.f32.xlu2 %v1663_v57 }
 0x3b5   : > { %v1526_v61 = vpop.f32.mrf.mxu3  ;;  %v1500_v49 = vpop.f32.mrf.mxu2 }
 0x3b6   : > { %v1527_v42 = vadd.f32 %v1526_v61, %v1394_v51  ;;  %v1501_v43 = vadd.f32 %v1500_v49, %v1399_v19  ;;  %v2344_v51 = vpop.permute.xlu1 %2343 }
 0x3b7   : > { %v2346_v53 = vunpack.i.h.bf16 %v2344_v51  ;;  %v2345_v60 = vunpack.i.l.bf16 %v2344_v51 }
 0x3b8   : > { %v1542_v18 = vmax.f32 %v1527_v42, 0.0  ;;  %v1545_v35 = vmax.f32 %v1501_v43, 0.0 }
 0x3b9   : > { %1760 = vmatpush.msra.mxu0 %v2345_v60 }
 0x3ba   : > { %v1668_v44 = vadd.f32 %v1667_v52, %v1542_v18  ;;  %v1672_v13 = vadd.f32 %v1671_v3, %v1545_v35 }
 0x3bb   : > { %1761 = vmatpush.msra.mxu0 %v2346_v53 }
 0x3bc   : > { %1669 = vadd.xlane.f32.xlu1 %v1668_v44 }
 0x3bd   : > { %v1529_v6 = vpop.f32.mrf.mxu3  ;;  %v1503_v12 = vpop.f32.mrf.mxu2 }
 0x3be   : > { %v1530_v16 = vadd.f32 %v1529_v6, %v1399_v19  ;;  %v1504_v23 = vadd.f32 %v1503_v12, %v3349_v4  ;;  %v1682_v19 = vmul.f32 512.0, %v2363_v15 }
 0x3c0   : > { %v1546_v28 = vmax.f32 %v1530_v16, 0.0  ;;  %v1549_v29 = vmax.f32 %v1504_v23, 0.0 }
 0x3c2   : > { %v1673_v36 = vadd.f32 %v1672_v13, %v1546_v28  ;;  %1614 = vmatpush.msrb.mxu2 %v1549_v29  ;;  %v1677_v46 = vadd.f32 %v1676_v40, %v1549_v29 }
 0x3c4   : > { %1674 = vadd.xlane.f32.xlu2 %v1673_v36  ;;  %1615 = vmatpush.msrb.mxu2 %v1545_v35 }
 0x3c5   : > { %v1532_v39 = vpop.f32.mrf.mxu3 }
 0x3c6   : > { %v1533_v17 = vadd.f32 %v1532_v39, %v3349_v4  ;;  %1616 = vmatpush.msrb.mxu2 %v1541_v34  ;;  %v1683_v4 = vsub.f32 1.0, %v1682_v19 }
 0x3c8   : > { %v1550_v47 = vmax.f32 %v1533_v17, 0.0  ;;  %1617 = vmatpush.msrb.mxu2 %v1537_v62  ;;  %v1684_v24 = vmul.f32 %v2363_v15, %v1683_v4 }
 0x3c9   : > { %2252 = vmatmul.msk.f32.vlgmr.msrb.gmra.mxu2 %vm1558_vm14, %v1551_v20 }
 0x3ca   : > { %1634 = vmatpush.msrb.mxu3 %v1550_v47  ;;  %v1678_v48 = vadd.f32 %v1677_v46, %v1550_v47  ;;  %v1685_v25 = vadd.f32 %v2363_v15, %v1684_v24 }
 0x3cc   : > { %1635 = vmatpush.msrb.mxu3 %v1546_v28  ;;  %1679 = vadd.xlane.f32.xlu2 %v1678_v48  ;;  %v1687_v9 = vsel %vm1686_vm8, %v2363_v15, %v1685_v25 }
 0x3ce   : > { %1636 = vmatpush.msrb.mxu3 %v1542_v18 }
 0x3d0   : > { %1637 = vmatpush.msrb.mxu3 %v1538_v11 }
 0x3d1   : > { %2253 = vmatmul.msk.f32.vlgmr.msrb.gmra.mxu3 %vm1558_vm14, %v1551_v20 }
 0x3e4   : > { %2348 = vrot.lane.b32.xlu2 %v2347_v27, %s2499_s24 }
 0x3ec   : > { %1555 = vperm.xlu2 %2352, %v1552_v45  }
 0x422   : > { %v1579_v63 = vpop.f32.mrf.mxu0 }
 0x427   : > { %v1665_v22 = vpop.xlane.xlu2 %1664 }
 0x428   : > { %v1688_v30 = vmul.f32 %v1687_v9, %v1665_v22  ;;  %v1599_v55 = vpop.f32.mrf.mxu1 }
 0x42a   : > { %1692 = vxpose.xlu1.b32.start [1/4] (short) (narrow) %v1688_v30, 8 }
 0x42f   : > { %v1670_v37 = vpop.xlane.xlu1 %1669 }
 0x430   : > { %v1689_v50 = vmul.f32 %v1687_v9, %v1670_v37 }
 0x432   : > { %1693 = vxpose.xlu1.b32.cont [2/4] (short) (narrow) %v1689_v50, 8 }
 0x437   : > { %v1675_v31 = vpop.xlane.xlu2 %1674 }
 0x438   : > { %v1690_v32 = vmul.f32 %v1687_v9, %v1675_v31 }
 0x43a   : > { %1694 = vxpose.xlu1.b32.cont [3/4] (short) (narrow) %v1690_v32, 8 }
 0x43f   : > { %v1680_v21 = vpop.xlane.xlu2 %1679 }
 0x440   : > { %v1691_v33 = vmul.f32 %v1687_v9, %v1680_v21 }
 0x442   : > { %1695 = vxpose.xlu1.b32.end [4/4] (short) (narrow) %v1691_v33, 8 }
 0x447   : > { %v2349_v38 = vpop.permute.xlu2 %2348 }
 0x448   : > { %v2351_v26 = vunpack.i.h.bf16 %v2349_v38  ;;  %v2350_v41 = vunpack.i.l.bf16 %v2349_v38 }
 0x44a   : > { %1762 = vmatpush.msra.mxu0 %v2350_v41 }
 0x44c   : > { %1763 = vmatpush.msra.mxu0 %v2351_v26  ;;  %v1619_v58 = vpop.f32.mrf.mxu2 }
 0x44f   : > { %v1556_v56 = vpop.permute.xlu2 %1555 }
 0x450   : > { %v1600_v62 = vadd.f32 %v1599_v55, %v1556_v56  ;;  %v1620_v1 = vadd.f32 %v1619_v58, %v1556_v56  ;;  %v1580_v10 = vadd.f32 %v1579_v63, %v1556_v56 }
 0x452   : > { %v1646_v7 = vrot.slane %v1600_v62, 7  ;;  %v1647_v11 = vrot.slane %v1620_v1, 6 }
 0x454   : > { %v1639_v59 = vpop.f32.mrf.mxu3  ;;  %v1650_v57 = vsel %vm1649_vm5, %v1580_v10, %v1646_v7 }
 0x455   : > { %v1640_v2 = vadd.f32 %v1639_v59, %v1556_v56 }
 0x457   : > { %v1648_v14 = vrot.slane %v1640_v2, 5 }
 0x459   : > { %v1652_v34 = vsel %vm1651_vm3, %v1647_v11, %v1648_v14 }
 0x45a   : > { %v1654_v61 = vsel %vm1035_vm0, %v1650_v57, %v1652_v34 }
 0x45b   : > { %1660 = vst.msk [vmem:[%s286_s19] sm:$0xf] %vm1658_vm12, %v1654_v61 }
 0x4ce   : > { %v1708_v54 = vpop.trf.xlu1 }
 0x4cf   : > { %2254 = vmatmul.msk.f32.vlgmr.msra.gmra.mxu0 %vm1558_vm14, %v1708_v54 }
 0x4d0   : > { %2403 = shalt.err (!%p2400_p5)
}
 0x4d1   : > { %2267 = dma.vmem_to_hbm [thread:$0]  (%p2579_p4), %s1796_s20, 64, %s1798_s21, %s1776_s17   ;;  %v1728_v5 = vld [vmem:[%s3434_s3 + $0x22] sm:$0x1]  ;;  %vm1768_vm0 = vcmask 106496  }
 0x4d2   : > { %s1806_s16 = scalar_lea.hbm %s3437_s6, %s2480_s28  ;;  %s292_s19 = scalar_lea.vmem [#allocation7], %s3370_s29 }
 0x4d3   : > { %s1808_s22 = sshll.u32 %s292_s19, 4  ;;  %s1810_s23 = sshll.u32 %s1806_s16, 4  ;;  %s1809_s22 = int_to_ptr.vmem [resolvable:$true] %s1808_s22  ;;  %s1811_s23 = int_to_ptr.hbm [resolvable:$true] %s1810_s23 }
 0x4d4   : > { %s1781_s24 = scalar_lea.sflag [#allocation8], %s3370_s29  ;;  %s2418_s20 = sshra.s32 %s1811_s23, 4  ;;  %s2419_s20 = int_to_ptr.hbm [resolvable:$true] %s2418_s20 }
 0x4d5   : > { %s2420_s21 = scalar_lea.hbm %s2419_s20, 1  ;;  %s2424_s30 = scalar_lea.hbm %s3437_s6, 2 }
 0x4d6   : > { %p2421_p6 = scmp.ne.s32.totalorder %s2419_s20, %s2420_s21  ;;  %p2425_p10 = scmp.lt.s32.totalorder %s2419_s20, %s3437_s6 }
 0x4d7   : > { %p2426_p11 = scmp.lt.s32.totalorder %s2424_s30, %s2420_s21 }
 0x4d8   : > { %p2422_p7 = pnand %p2421_p6, %p2579_p4 }
 0x4d9   : > { %p2427_p12 = por %p2426_p11, %p2425_p10 }
 0x4da   : > { %p2423_p9 = pneg %p2422_p7 }
 0x4dc   : > { %p2428_p13 = pnand %p2427_p12, %p2423_p9 }
 0x54c   : > { %v1765_v8 = vpop.f32.mrf.mxu0 }
 0x54d   : > { %v1766_v42 = vadd.f32 %v1765_v8, %v1728_v5 }
 0x54f   : > { %1769 = vst.msk [vmem:[%s292_s19] sm:$0x1] %vm1768_vm0, %v1766_v42 }
 0x550   : > { %2431 = shalt.err (!%p2428_p13)
}
 0x551   : > { %2268 = dma.vmem_to_hbm [thread:$0]  (%p2579_p4), %s1809_s22, 16, %s1811_s23, %s1781_s24  }
 0x552 PF: > { %p2278_p0 = scmp.ge.s32.totalorder %s2488_s0, 2  ;;  %s1830_s29 = sand.u32 1, %s2468_s25  }
 0x553   : > { %s1831_s11 = scalar_lea.sflag [#allocation6], %s1830_s29 }
 0x554   : > { %p2272_p1 = pnand %p2278_p0, %p2586_p8 }
 0x556   : > { %p2273_p2 = pneg %p2272_p1 }
 0x558   : > { %2459 = dma.done.wait (%p2273_p2), %s1831_s11, 64  }
 0x559   : > { %2461 = vsyncadd (%p2273_p2), %s1831_s11, 4294967232  ;;  %s1841_s8 = scalar_lea.sflag [#allocation8], %s1830_s29 }
 0x55a   : > { %2463 = dma.done.wait (%p2273_p2), %s1841_s8, 16  }
 0x55b   : > { %2465 = vsyncadd (%p2273_p2), %s1841_s8, 4294967280  ;;  %s31_s0 = sadd.s32 1, %s2488_s0   ;;  %s3517_s28 = sld [smem:[#allocation12_spill]] }
 0x55c   : > { %p28_p3 = scmp.ge.s32.totalorder %s31_s0, 4   ;;  %s3518_s29 = sld [smem:[#allocation13_spill]] }
 0x55d   : > { %s3519_s25 = smov %s2472_s26  ;;  %s3520_s26 = smov %s2476_s27 }
 0x55e   : > { %s3521_s27 = smov %s2592_s13  ;;  %30 = sbr.rel (!%p28_p3) target bundleno = 12 (0xc), region = 107 }
 0x563   :  { %1846 = vsyncpa [#allocation6], 1 }
 0x564   :  { %1848 = vsyncpa [#allocation6 + $0x1], 1 }
 0x565   :  { %1849 = vsyncpa [#allocation8], 1 }
 0x566   :  { %1851 = vsyncpa [#allocation8 + $0x1], 1 }

</bundles_post_ra>
